<compile_context>
chip_gen: v7x
topology: tpu7x:2x2x1
jax: 0.10.0
libtpu: 0.0.40
codegen_flags: <defaults>
</compile_context>

<pallas_src>
import functools

import jax
import jax.numpy as jnp
from jax import lax
from jax.experimental import pallas as pl
from jax.experimental.pallas import tpu as pltpu


def _vmem_limit_bytes():
    """Generation-aware scoped-VMEM limit (>=32 MiB, ~half of physical)."""
    try:
        cap = int(pltpu.get_tpu_info().vmem_capacity_bytes)
    except Exception:
        return 32 * 1024 * 1024
    return max(32 * 1024 * 1024, min(cap // 2, 96 * 1024 * 1024))


# ----------------------------------------------------------------------------
# Kernel 1: fused qkv projection + per-token head attention, tokens-in-lanes.
#   x tile:   (1, T, C)         wqkv_t: (3C, C) bf16 (scale folded into q rows)
#   eye:      (T, T) f32        (identity, used as an MXU transpose)
#   attn out: (1, T, H*H) f32   o out: (H, T, Dh) bf16 (the "mixed" layout)
# ----------------------------------------------------------------------------
def qkv_attn_kernel(x_ref, wqkv_t_ref, eye_ref, attn_ref, o_ref, *,
                    num_heads, seq_len):
    T = x_ref.shape[1]
    C = x_ref.shape[2]
    H = num_heads
    Dh = C // H
    HH = H * H

    # Mask ragged token lanes (last tile when N % T != 0) so garbage never
    # reaches the exp / identity-matmul paths.
    j = pl.program_id(1)
    tok = j * T + lax.broadcasted_iota(jnp.int32, (T, 1), 0)          # (T, 1)
    x = jnp.where(tok < seq_len, x_ref[0], 0.0).astype(jnp.bfloat16)  # (T, C)

    # qkv^T = W_qkv^T @ x^T with tokens on the lane axis (bf16 MXU, f32 acc).
    # qkv_bias=False -> no bias term.
    qkv_t = lax.dot_general(wqkv_t_ref[...], x,
                            (((1,), (1,)), ((), ())),
                            preferred_element_type=jnp.float32)        # (3C, T)
    q_t = qkv_t[0:C]                                                   # (C, T)
    k_t = qkv_t[C:2 * C]
    v_t = qkv_t[2 * C:3 * C]
    k_slab = [k_t[g * Dh:(g + 1) * Dh, :] for g in range(H)]           # (Dh, T)
    v_slab = [v_t[g * Dh:(g + 1) * Dh, :] for g in range(H)]

    p_rows = []   # per query-head softmax probs, (H, T)
    o_rows = []   # per query-head attention output, (Dh, T)
    for h in range(H):
        q_h = q_t[h * Dh:(h + 1) * Dh, :]                              # (Dh, T)
        # s[g, t] = scale * sum_d q[t,h,d] k[t,g,d]
        # (scale already folded into the q weight rows).
        s_h = jnp.concatenate(
            [jnp.sum(q_h * k_slab[g], axis=0, keepdims=True)
             for g in range(H)], axis=0)                               # (H, T)
        m = jnp.max(s_h, axis=0, keepdims=True)
        e = jnp.exp(s_h - m)
        denom = jnp.sum(e, axis=0, keepdims=True)
        p_h = e * pl.reciprocal(denom, approx=True)                    # (H, T)

        # o[d, t] = sum_g p[g, t] * v[t, g, d]  (lane-parallel FMAs)
        o_h = p_h[0:1, :] * v_slab[0]
        for g in range(1, H):
            o_h = o_h + p_h[g:g + 1, :] * v_slab[g]                    # (Dh, T)

        p_rows.append(p_h)
        o_rows.append(o_h)

    # Single MXU identity-matmul moves everything back to tokens-on-sublanes
    # for the stores (avoids relying on generic XLU transpose lowering).
    big = jnp.concatenate(p_rows + o_rows, axis=0)                     # (HH+C, T)
    big_t = lax.dot_general(eye_ref[...], big, (((1,), (1,)), ((), ())),
                            preferred_element_type=jnp.float32)        # (T, HH+C)

    # attn slab: one dense (T, H*H) store.
    attn_ref[0] = big_t[:, :HH].astype(attn_ref.dtype)
    # o in the "mixed" layout o_perm[b*H + h, n, d] = (attn @ v)[b, n, h, d].
    for h in range(H):
        o_ref[h] = big_t[:, HH + h * Dh:HH + (h + 1) * Dh].astype(o_ref.dtype)


def qkv_attention(x, wqkv_t, num_heads, *, block_t=256):
    """x: (B, N, C); wqkv_t: (3C, C) bf16 with softmax scale folded into q rows.

    Returns:
      attn:   (B, N, H*H) f32    (free reshape to (B, N, H, H))
      o_perm: (B*H, N, Dh) bf16  (free reshape to the reference's
              (attn @ v).transpose(1, 2).reshape(B*N, C))
    """
    B, N, C = x.shape
    H = num_heads
    Dh = C // H
    Tn = min(block_t, N)                      # token tile (lane axis in-kernel)
    eye = jnp.eye(Tn, dtype=jnp.float32)

    kernel = functools.partial(qkv_attn_kernel, num_heads=H, seq_len=N)
    attn, o_perm = pl.pallas_call(
        kernel,
        out_shape=(
            jax.ShapeDtypeStruct((B, N, H * H), jnp.float32),
            jax.ShapeDtypeStruct((B * H, N, Dh), jnp.bfloat16),
        ),
        grid=(B, pl.cdiv(N, Tn)),
        in_specs=[
            pl.BlockSpec((1, Tn, C), lambda b, j: (b, j, 0)),
            pl.BlockSpec((3 * C, C), lambda b, j: (0, 0)),   # resident weight
            pl.BlockSpec((Tn, Tn), lambda b, j: (0, 0)),     # resident identity
        ],
        out_specs=(
            pl.BlockSpec((1, Tn, H * H), lambda b, j: (b, j, 0)),
            pl.BlockSpec((H, Tn, Dh), lambda b, j: (b, j, 0)),
        ),
        compiler_params=pltpu.CompilerParams(
            dimension_semantics=("parallel", "parallel"),
            vmem_limit_bytes=_vmem_limit_bytes(),
        ),
    )(x, wqkv_t, eye)
    return attn, o_perm


# ----------------------------------------------------------------------------
# Kernel 2: canonical tiled linear  Y = X @ W + b  with f32 accumulator.
# ----------------------------------------------------------------------------
def _pick_k_tile(K, pref, quantum=128):
    """Largest 128-multiple divisor of K that is <= pref (K itself if small)."""
    if K <= pref:
        return K
    t = (pref // quantum) * quantum
    while t >= quantum:
        if K % t == 0:
            return t
        t -= quantum
    return K   # awkward K: single full-K step (still correct)


def linear_kernel(x_ref, w_ref, b_ref, o_ref, acc_ref):
    @pl.when(pl.program_id(2) == 0)
    def _():
        acc_ref[...] = jnp.zeros_like(acc_ref)

    acc_ref[...] += jnp.dot(x_ref[...], w_ref[...],
                            preferred_element_type=jnp.float32)

    @pl.when(pl.program_id(2) == pl.num_programs(2) - 1)
    def _():
        o_ref[...] = (acc_ref[...] + b_ref[...].astype(jnp.float32)
                      ).astype(o_ref.dtype)


def linear(x, w, b, out_dtype, *, bm=256, bn=256, bk=512):
    """x: (M, K) bf16, w: (K, N) bf16, b: (N,) f32 -> (M, N) out_dtype."""
    M, K = x.shape
    N = w.shape[1]
    tm = min(bm, M)            # ragged M handled by the grid (masked writeback)
    tn = min(bn, N)            # ragged N handled by the grid
    tk = _pick_k_tile(K, bk)   # K tile must divide K exactly (accumulation)

    return pl.pallas_call(
        linear_kernel,
        out_shape=jax.ShapeDtypeStruct((M, N), out_dtype),
        grid=(pl.cdiv(M, tm), pl.cdiv(N, tn), K // tk),
        in_specs=[
            pl.BlockSpec((tm, tk), lambda i, j, k: (i, k)),
            pl.BlockSpec((tk, tn), lambda i, j, k: (k, j)),
            pl.BlockSpec((1, tn), lambda i, j, k: (0, j)),
        ],
        out_specs=pl.BlockSpec((tm, tn), lambda i, j, k: (i, j)),
        scratch_shapes=[pltpu.VMEM((tm, tn), jnp.float32)],
        compiler_params=pltpu.CompilerParams(
            dimension_semantics=("parallel", "parallel", "arbitrary"),
            vmem_limit_bytes=_vmem_limit_bytes(),
        ),
    )(x, w, b.reshape(1, N))


# ----------------------------------------------------------------------------
# Full forward pass.
# ----------------------------------------------------------------------------
def adaptive_mha(x, w_qkv, w_proj, b_proj, num_heads):
    """x: (B, N, C); w_qkv: (C, 3C); w_proj: (C, C); b_proj: (C,)."""
    B, N, C = x.shape
    H = num_heads
    assert C % H == 0
    scale = float(C // H) ** -0.5

    # One-time weight prep: transpose to (3C, C), fold the softmax scale into
    # the q rows, cast to bf16 for the MXU.
    wq_t = (w_qkv[:, :C] * scale).T
    wk_t = w_qkv[:, C:2 * C].T
    wv_t = w_qkv[:, 2 * C:].T
    wqkv_t = jnp.concatenate([wq_t, wk_t, wv_t], axis=0).astype(jnp.bfloat16)
    w_proj_bf = w_proj.astype(jnp.bfloat16)

    # Fused qkv projection + per-token head attention.
    attn, o_perm = qkv_attention(x, wqkv_t, H)

    # o_perm is already (B, H, N, Dh)-contiguous, so the reference's
    # (attn @ v).transpose(1, 2).reshape(B, N, C) is a free reshape here.
    o_mixed = o_perm.reshape(B * N, C)

    # Output projection (attn_drop / proj_drop are p=0.0 identities).
    out = linear(o_mixed, w_proj_bf, b_proj, x.dtype).reshape(B, N, C)
    attn = attn.reshape(B, N, H, H)
    return out, attn


# ----------------------------------------------------------------------------
# Pure-JAX reference mirroring the PyTorch forward (sanity check).
# ----------------------------------------------------------------------------
def reference(x, w_qkv, w_proj, b_proj, num_heads):
    B, N, C = x.shape
    H = num_heads
    Dh = C // H
    qkv = (x @ w_qkv).reshape(B, N, 3, H, Dh)
    q, k, v = qkv[:, :, 0], qkv[:, :, 1], qkv[:, :, 2]
    attn = jnp.einsum("bnhd,bngd->bnhg", q, k) * (Dh ** -0.5)
    attn = jax.nn.softmax(attn, axis=-1)
    o = jnp.einsum("bnhg,bngd->bnhd", attn, v)
    o = o.transpose(0, 2, 1, 3).reshape(B, N, C)
    out = o @ w_proj + b_proj
    return out, attn


if __name__ == "__main__":
    B, N, C, H = 2, 8, 32, 8  # Dh = 4

    key = jax.random.PRNGKey(0)
    k1, k2, k3, k4 = jax.random.split(key, 4)
    x = jax.random.normal(k1, (B, N, C), jnp.float32)
    # Synthetic parameters (shapes from nn.Linear in __init__), math layout.
    w_qkv = jax.random.normal(k2, (C, 3 * C), jnp.float32) * 0.05   # qkv.weight.T
    w_proj = jax.random.normal(k3, (C, C), jnp.float32) * 0.05      # proj.weight.T
    b_proj = jax.random.normal(k4, (C,), jnp.float32) * 0.05        # proj.bias

    out, attn = adaptive_mha(x, w_qkv, w_proj, b_proj, H)
    jax.block_until_ready((out, attn))

    assert out.shape == (B, N, C), out.shape
    assert attn.shape == (B, N, H, H), attn.shape

    ref_out, ref_attn = reference(x, w_qkv, w_proj, b_proj, H)
    assert jnp.allclose(out, ref_out, atol=2e-2, rtol=2e-2)
    assert jnp.allclose(attn, ref_attn, atol=2e-2, rtol=2e-2)

    print("KERNEL_OK")
</pallas_src>

<mosaic_0001>
module attributes {stable_mosaic.version = 11 : i64} {
  func.func @qkv_attn_kernel(%arg0: i32, %arg1: i32, %arg2: memref<1x8x32xf32, #tpu.memory_space<vmem>>, %arg3: memref<96x32xbf16, #tpu.memory_space<vmem>>, %arg4: memref<8x8xf32, #tpu.memory_space<vmem>>, %arg5: memref<1x8x64xf32, #tpu.memory_space<vmem>>, %arg6: memref<8x8x4xbf16, #tpu.memory_space<vmem>>) attributes {dimension_semantics = [#tpu.dimension_semantics<parallel>, #tpu.dimension_semantics<parallel>], iteration_bounds = array<i64: 2, 1>, scalar_prefetch = 0 : i64, scratch_operands = 0 : i64, tpu.core_type = #tpu.core_type<tc>, window_params = [{transform_indices = @transform_0, window_bounds = array<i64: 1, 8, 32>}, {pipeline_mode = #tpu.pipeline_mode<synchronous>, transform_indices = @transform_1, window_bounds = array<i64: 96, 32>}, {pipeline_mode = #tpu.pipeline_mode<synchronous>, transform_indices = @transform_2, window_bounds = array<i64: 8, 8>}, {transform_indices = @transform_3, window_bounds = array<i64: 1, 8, 64>}, {transform_indices = @transform_4, window_bounds = array<i64: 8, 8, 4>}]} {
    %c8_i32 = arith.constant 8 : i32
    %0 = arith.muli %arg1, %c8_i32 : i32
    %1 = tpu.iota {dimensions = array<i32: 0>} : vector<8x1xi32>
    %2 = vector.broadcast %0 : i32 to vector<8x1xi32>
    %3 = arith.addi %2, %1 : vector<8x1xi32>
    %c8_i32_0 = arith.constant 8 : i32
    %4 = vector.broadcast %c8_i32_0 : i32 to vector<8x1xi32>
    %5 = arith.cmpi slt, %3, %4 : vector<8x1xi32>
    %c0 = arith.constant 0 : index
    %c0_1 = arith.constant 0 : index
    %c0_2 = arith.constant 0 : index
    %6 = vector.load %arg2[%c0, %c0_1, %c0_2] : memref<1x8x32xf32, #tpu.memory_space<vmem>>, vector<1x8x32xf32>
    %7 = vector.shape_cast %6 : vector<1x8x32xf32> to vector<8x32xf32>
    %cst = arith.constant 0.000000e+00 : f32
    %8 = vector.shape_cast %5 : vector<8x1xi1> to vector<8x1xi1>
    %9 = vector.broadcast %8 : vector<8x1xi1> to vector<8x32xi1>
    %10 = vector.broadcast %cst : f32 to vector<8x32xf32>
    %11 = arith.select %9, %7, %10 : vector<8x32xi1>, vector<8x32xf32>
    %12 = arith.truncf %11 : vector<8x32xf32> to vector<8x32xbf16>
    %c0_3 = arith.constant 0 : index
    %c0_4 = arith.constant 0 : index
    %13 = vector.load %arg3[%c0_3, %c0_4] : memref<96x32xbf16, #tpu.memory_space<vmem>>, vector<96x32xbf16>
    %cst_5 = arith.constant dense<0.000000e+00> : vector<96x8xf32>
    %14 = tpu.matmul %13, %12, %cst_5 {dimension_numbers = #tpu.dot_dimension_numbers<[1], [1], [0], [0], [0, 0, 1, 0], [], []>} : vector<96x32xbf16>, vector<8x32xbf16>, vector<96x8xf32> -> vector<96x8xf32>
    %15 = vector.extract_strided_slice %14 {offsets = [0, 0], sizes = [32, 8], strides = [1, 1]} : vector<96x8xf32> to vector<32x8xf32>
    %16 = vector.extract_strided_slice %14 {offsets = [32, 0], sizes = [32, 8], strides = [1, 1]} : vector<96x8xf32> to vector<32x8xf32>
    %17 = vector.extract_strided_slice %14 {offsets = [64, 0], sizes = [32, 8], strides = [1, 1]} : vector<96x8xf32> to vector<32x8xf32>
    %18 = vector.extract_strided_slice %16 {offsets = [0, 0], sizes = [4, 8], strides = [1, 1]} : vector<32x8xf32> to vector<4x8xf32>
    %19 = vector.extract_strided_slice %16 {offsets = [4, 0], sizes = [4, 8], strides = [1, 1]} : vector<32x8xf32> to vector<4x8xf32>
    %20 = vector.extract_strided_slice %16 {offsets = [8, 0], sizes = [4, 8], strides = [1, 1]} : vector<32x8xf32> to vector<4x8xf32>
    %21 = vector.extract_strided_slice %16 {offsets = [12, 0], sizes = [4, 8], strides = [1, 1]} : vector<32x8xf32> to vector<4x8xf32>
    %22 = vector.extract_strided_slice %16 {offsets = [16, 0], sizes = [4, 8], strides = [1, 1]} : vector<32x8xf32> to vector<4x8xf32>
    %23 = vector.extract_strided_slice %16 {offsets = [20, 0], sizes = [4, 8], strides = [1, 1]} : vector<32x8xf32> to vector<4x8xf32>
    %24 = vector.extract_strided_slice %16 {offsets = [24, 0], sizes = [4, 8], strides = [1, 1]} : vector<32x8xf32> to vector<4x8xf32>
    %25 = vector.extract_strided_slice %16 {offsets = [28, 0], sizes = [4, 8], strides = [1, 1]} : vector<32x8xf32> to vector<4x8xf32>
    %26 = vector.extract_strided_slice %17 {offsets = [0, 0], sizes = [4, 8], strides = [1, 1]} : vector<32x8xf32> to vector<4x8xf32>
    %27 = vector.extract_strided_slice %17 {offsets = [4, 0], sizes = [4, 8], strides = [1, 1]} : vector<32x8xf32> to vector<4x8xf32>
    %28 = vector.extract_strided_slice %17 {offsets = [8, 0], sizes = [4, 8], strides = [1, 1]} : vector<32x8xf32> to vector<4x8xf32>
    %29 = vector.extract_strided_slice %17 {offsets = [12, 0], sizes = [4, 8], strides = [1, 1]} : vector<32x8xf32> to vector<4x8xf32>
    %30 = vector.extract_strided_slice %17 {offsets = [16, 0], sizes = [4, 8], strides = [1, 1]} : vector<32x8xf32> to vector<4x8xf32>
    %31 = vector.extract_strided_slice %17 {offsets = [20, 0], sizes = [4, 8], strides = [1, 1]} : vector<32x8xf32> to vector<4x8xf32>
    %32 = vector.extract_strided_slice %17 {offsets = [24, 0], sizes = [4, 8], strides = [1, 1]} : vector<32x8xf32> to vector<4x8xf32>
    %33 = vector.extract_strided_slice %17 {offsets = [28, 0], sizes = [4, 8], strides = [1, 1]} : vector<32x8xf32> to vector<4x8xf32>
    %34 = vector.extract_strided_slice %15 {offsets = [0, 0], sizes = [4, 8], strides = [1, 1]} : vector<32x8xf32> to vector<4x8xf32>
    %35 = arith.mulf %34, %18 : vector<4x8xf32>
    %cst_6 = arith.constant dense<0.000000e+00> : vector<8xf32>
    %36 = vector.multi_reduction <add>, %35, %cst_6 [0] : vector<4x8xf32> to vector<8xf32>
    %37 = vector.shape_cast %36 : vector<8xf32> to vector<1x8xf32>
    %38 = arith.mulf %34, %19 : vector<4x8xf32>
    %cst_7 = arith.constant dense<0.000000e+00> : vector<8xf32>
    %39 = vector.multi_reduction <add>, %38, %cst_7 [0] : vector<4x8xf32> to vector<8xf32>
    %40 = vector.shape_cast %39 : vector<8xf32> to vector<1x8xf32>
    %41 = arith.mulf %34, %20 : vector<4x8xf32>
    %cst_8 = arith.constant dense<0.000000e+00> : vector<8xf32>
    %42 = vector.multi_reduction <add>, %41, %cst_8 [0] : vector<4x8xf32> to vector<8xf32>
    %43 = vector.shape_cast %42 : vector<8xf32> to vector<1x8xf32>
    %44 = arith.mulf %34, %21 : vector<4x8xf32>
    %cst_9 = arith.constant dense<0.000000e+00> : vector<8xf32>
    %45 = vector.multi_reduction <add>, %44, %cst_9 [0] : vector<4x8xf32> to vector<8xf32>
    %46 = vector.shape_cast %45 : vector<8xf32> to vector<1x8xf32>
    %47 = arith.mulf %34, %22 : vector<4x8xf32>
    %cst_10 = arith.constant dense<0.000000e+00> : vector<8xf32>
    %48 = vector.multi_reduction <add>, %47, %cst_10 [0] : vector<4x8xf32> to vector<8xf32>
    %49 = vector.shape_cast %48 : vector<8xf32> to vector<1x8xf32>
    %50 = arith.mulf %34, %23 : vector<4x8xf32>
    %cst_11 = arith.constant dense<0.000000e+00> : vector<8xf32>
    %51 = vector.multi_reduction <add>, %50, %cst_11 [0] : vector<4x8xf32> to vector<8xf32>
    %52 = vector.shape_cast %51 : vector<8xf32> to vector<1x8xf32>
    %53 = arith.mulf %34, %24 : vector<4x8xf32>
    %cst_12 = arith.constant dense<0.000000e+00> : vector<8xf32>
    %54 = vector.multi_reduction <add>, %53, %cst_12 [0] : vector<4x8xf32> to vector<8xf32>
    %55 = vector.shape_cast %54 : vector<8xf32> to vector<1x8xf32>
    %56 = arith.mulf %34, %25 : vector<4x8xf32>
    %cst_13 = arith.constant dense<0.000000e+00> : vector<8xf32>
    %57 = vector.multi_reduction <add>, %56, %cst_13 [0] : vector<4x8xf32> to vector<8xf32>
    %58 = vector.shape_cast %57 : vector<8xf32> to vector<1x8xf32>
    %59 = tpu.concatenate %37, %40, %43, %46, %49, %52, %55, %58 in 0 : vector<1x8xf32>, vector<1x8xf32>, vector<1x8xf32>, vector<1x8xf32>, vector<1x8xf32>, vector<1x8xf32>, vector<1x8xf32>, vector<1x8xf32> -> vector<8x8xf32>
    %cst_14 = arith.constant dense<0xFF800000> : vector<8xf32>
    %60 = vector.multi_reduction <maximumf>, %59, %cst_14 [0] : vector<8x8xf32> to vector<8xf32>
    %61 = vector.shape_cast %60 : vector<8xf32> to vector<1x8xf32>
    %62 = vector.broadcast %61 : vector<1x8xf32> to vector<8x8xf32>
    %63 = arith.subf %59, %62 : vector<8x8xf32>
    %64 = math.exp %63 : vector<8x8xf32>
    %cst_15 = arith.constant dense<0.000000e+00> : vector<8xf32>
    %65 = vector.multi_reduction <add>, %64, %cst_15 [0] : vector<8x8xf32> to vector<8xf32>
    %66 = vector.shape_cast %65 : vector<8xf32> to vector<1x8xf32>
    %67 = tpu.reciprocal %66 {approx = true} : vector<1x8xf32> -> vector<1x8xf32>
    %68 = vector.broadcast %67 : vector<1x8xf32> to vector<8x8xf32>
    %69 = arith.mulf %64, %68 : vector<8x8xf32>
    %70 = vector.extract_strided_slice %69 {offsets = [0, 0], sizes = [1, 8], strides = [1, 1]} : vector<8x8xf32> to vector<1x8xf32>
    %71 = vector.broadcast %70 : vector<1x8xf32> to vector<4x8xf32>
    %72 = arith.mulf %71, %26 : vector<4x8xf32>
    %73 = vector.extract_strided_slice %69 {offsets = [1, 0], sizes = [1, 8], strides = [1, 1]} : vector<8x8xf32> to vector<1x8xf32>
    %74 = vector.broadcast %73 : vector<1x8xf32> to vector<4x8xf32>
    %75 = arith.mulf %74, %27 : vector<4x8xf32>
    %76 = arith.addf %72, %75 : vector<4x8xf32>
    %77 = vector.extract_strided_slice %69 {offsets = [2, 0], sizes = [1, 8], strides = [1, 1]} : vector<8x8xf32> to vector<1x8xf32>
    %78 = vector.broadcast %77 : vector<1x8xf32> to vector<4x8xf32>
    %79 = arith.mulf %78, %28 : vector<4x8xf32>
    %80 = arith.addf %76, %79 : vector<4x8xf32>
    %81 = vector.extract_strided_slice %69 {offsets = [3, 0], sizes = [1, 8], strides = [1, 1]} : vector<8x8xf32> to vector<1x8xf32>
    %82 = vector.broadcast %81 : vector<1x8xf32> to vector<4x8xf32>
    %83 = arith.mulf %82, %29 : vector<4x8xf32>
    %84 = arith.addf %80, %83 : vector<4x8xf32>
    %85 = vector.extract_strided_slice %69 {offsets = [4, 0], sizes = [1, 8], strides = [1, 1]} : vector<8x8xf32> to vector<1x8xf32>
    %86 = vector.broadcast %85 : vector<1x8xf32> to vector<4x8xf32>
    %87 = arith.mulf %86, %30 : vector<4x8xf32>
    %88 = arith.addf %84, %87 : vector<4x8xf32>
    %89 = vector.extract_strided_slice %69 {offsets = [5, 0], sizes = [1, 8], strides = [1, 1]} : vector<8x8xf32> to vector<1x8xf32>
    %90 = vector.broadcast %89 : vector<1x8xf32> to vector<4x8xf32>
    %91 = arith.mulf %90, %31 : vector<4x8xf32>
    %92 = arith.addf %88, %91 : vector<4x8xf32>
    %93 = vector.extract_strided_slice %69 {offsets = [6, 0], sizes = [1, 8], strides = [1, 1]} : vector<8x8xf32> to vector<1x8xf32>
    %94 = vector.broadcast %93 : vector<1x8xf32> to vector<4x8xf32>
    %95 = arith.mulf %94, %32 : vector<4x8xf32>
    %96 = arith.addf %92, %95 : vector<4x8xf32>
    %97 = vector.extract_strided_slice %69 {offsets = [7, 0], sizes = [1, 8], strides = [1, 1]} : vector<8x8xf32> to vector<1x8xf32>
    %98 = vector.broadcast %97 : vector<1x8xf32> to vector<4x8xf32>
    %99 = arith.mulf %98, %33 : vector<4x8xf32>
    %100 = arith.addf %96, %99 : vector<4x8xf32>
    %101 = vector.extract_strided_slice %15 {offsets = [4, 0], sizes = [4, 8], strides = [1, 1]} : vector<32x8xf32> to vector<4x8xf32>
    %102 = arith.mulf %101, %18 : vector<4x8xf32>
    %cst_16 = arith.constant dense<0.000000e+00> : vector<8xf32>
    %103 = vector.multi_reduction <add>, %102, %cst_16 [0] : vector<4x8xf32> to vector<8xf32>
    %104 = vector.shape_cast %103 : vector<8xf32> to vector<1x8xf32>
    %105 = arith.mulf %101, %19 : vector<4x8xf32>
    %cst_17 = arith.constant dense<0.000000e+00> : vector<8xf32>
    %106 = vector.multi_reduction <add>, %105, %cst_17 [0] : vector<4x8xf32> to vector<8xf32>
    %107 = vector.shape_cast %106 : vector<8xf32> to vector<1x8xf32>
    %108 = arith.mulf %101, %20 : vector<4x8xf32>
    %cst_18 = arith.constant dense<0.000000e+00> : vector<8xf32>
    %109 = vector.multi_reduction <add>, %108, %cst_18 [0] : vector<4x8xf32> to vector<8xf32>
    %110 = vector.shape_cast %109 : vector<8xf32> to vector<1x8xf32>
    %111 = arith.mulf %101, %21 : vector<4x8xf32>
    %cst_19 = arith.constant dense<0.000000e+00> : vector<8xf32>
    %112 = vector.multi_reduction <add>, %111, %cst_19 [0] : vector<4x8xf32> to vector<8xf32>
    %113 = vector.shape_cast %112 : vector<8xf32> to vector<1x8xf32>
    %114 = arith.mulf %101, %22 : vector<4x8xf32>
    %cst_20 = arith.constant dense<0.000000e+00> : vector<8xf32>
    %115 = vector.multi_reduction <add>, %114, %cst_20 [0] : vector<4x8xf32> to vector<8xf32>
    %116 = vector.shape_cast %115 : vector<8xf32> to vector<1x8xf32>
    %117 = arith.mulf %101, %23 : vector<4x8xf32>
    %cst_21 = arith.constant dense<0.000000e+00> : vector<8xf32>
    %118 = vector.multi_reduction <add>, %117, %cst_21 [0] : vector<4x8xf32> to vector<8xf32>
    %119 = vector.shape_cast %118 : vector<8xf32> to vector<1x8xf32>
    %120 = arith.mulf %101, %24 : vector<4x8xf32>
    %cst_22 = arith.constant dense<0.000000e+00> : vector<8xf32>
    %121 = vector.multi_reduction <add>, %120, %cst_22 [0] : vector<4x8xf32> to vector<8xf32>
    %122 = vector.shape_cast %121 : vector<8xf32> to vector<1x8xf32>
    %123 = arith.mulf %101, %25 : vector<4x8xf32>
    %cst_23 = arith.constant dense<0.000000e+00> : vector<8xf32>
    %124 = vector.multi_reduction <add>, %123, %cst_23 [0] : vector<4x8xf32> to vector<8xf32>
    %125 = vector.shape_cast %124 : vector<8xf32> to vector<1x8xf32>
    %126 = tpu.concatenate %104, %107, %110, %113, %116, %119, %122, %125 in 0 : vector<1x8xf32>, vector<1x8xf32>, vector<1x8xf32>, vector<1x8xf32>, vector<1x8xf32>, vector<1x8xf32>, vector<1x8xf32>, vector<1x8xf32> -> vector<8x8xf32>
    %cst_24 = arith.constant dense<0xFF800000> : vector<8xf32>
    %127 = vector.multi_reduction <maximumf>, %126, %cst_24 [0] : vector<8x8xf32> to vector<8xf32>
    %128 = vector.shape_cast %127 : vector<8xf32> to vector<1x8xf32>
    %129 = vector.broadcast %128 : vector<1x8xf32> to vector<8x8xf32>
    %130 = arith.subf %126, %129 : vector<8x8xf32>
    %131 = math.exp %130 : vector<8x8xf32>
    %cst_25 = arith.constant dense<0.000000e+00> : vector<8xf32>
    %132 = vector.multi_reduction <add>, %131, %cst_25 [0] : vector<8x8xf32> to vector<8xf32>
    %133 = vector.shape_cast %132 : vector<8xf32> to vector<1x8xf32>
    %134 = tpu.reciprocal %133 {approx = true} : vector<1x8xf32> -> vector<1x8xf32>
    %135 = vector.broadcast %134 : vector<1x8xf32> to vector<8x8xf32>
    %136 = arith.mulf %131, %135 : vector<8x8xf32>
    %137 = vector.extract_strided_slice %136 {offsets = [0, 0], sizes = [1, 8], strides = [1, 1]} : vector<8x8xf32> to vector<1x8xf32>
    %138 = vector.broadcast %137 : vector<1x8xf32> to vector<4x8xf32>
    %139 = arith.mulf %138, %26 : vector<4x8xf32>
    %140 = vector.extract_strided_slice %136 {offsets = [1, 0], sizes = [1, 8], strides = [1, 1]} : vector<8x8xf32> to vector<1x8xf32>
    %141 = vector.broadcast %140 : vector<1x8xf32> to vector<4x8xf32>
    %142 = arith.mulf %141, %27 : vector<4x8xf32>
    %143 = arith.addf %139, %142 : vector<4x8xf32>
    %144 = vector.extract_strided_slice %136 {offsets = [2, 0], sizes = [1, 8], strides = [1, 1]} : vector<8x8xf32> to vector<1x8xf32>
    %145 = vector.broadcast %144 : vector<1x8xf32> to vector<4x8xf32>
    %146 = arith.mulf %145, %28 : vector<4x8xf32>
    %147 = arith.addf %143, %146 : vector<4x8xf32>
    %148 = vector.extract_strided_slice %136 {offsets = [3, 0], sizes = [1, 8], strides = [1, 1]} : vector<8x8xf32> to vector<1x8xf32>
    %149 = vector.broadcast %148 : vector<1x8xf32> to vector<4x8xf32>
    %150 = arith.mulf %149, %29 : vector<4x8xf32>
    %151 = arith.addf %147, %150 : vector<4x8xf32>
    %152 = vector.extract_strided_slice %136 {offsets = [4, 0], sizes = [1, 8], strides = [1, 1]} : vector<8x8xf32> to vector<1x8xf32>
    %153 = vector.broadcast %152 : vector<1x8xf32> to vector<4x8xf32>
    %154 = arith.mulf %153, %30 : vector<4x8xf32>
    %155 = arith.addf %151, %154 : vector<4x8xf32>
    %156 = vector.extract_strided_slice %136 {offsets = [5, 0], sizes = [1, 8], strides = [1, 1]} : vector<8x8xf32> to vector<1x8xf32>
    %157 = vector.broadcast %156 : vector<1x8xf32> to vector<4x8xf32>
    %158 = arith.mulf %157, %31 : vector<4x8xf32>
    %159 = arith.addf %155, %158 : vector<4x8xf32>
    %160 = vector.extract_strided_slice %136 {offsets = [6, 0], sizes = [1, 8], strides = [1, 1]} : vector<8x8xf32> to vector<1x8xf32>
    %161 = vector.broadcast %160 : vector<1x8xf32> to vector<4x8xf32>
    %162 = arith.mulf %161, %32 : vector<4x8xf32>
    %163 = arith.addf %159, %162 : vector<4x8xf32>
    %164 = vector.extract_strided_slice %136 {offsets = [7, 0], sizes = [1, 8], strides = [1, 1]} : vector<8x8xf32> to vector<1x8xf32>
    %165 = vector.broadcast %164 : vector<1x8xf32> to vector<4x8xf32>
    %166 = arith.mulf %165, %33 : vector<4x8xf32>
    %167 = arith.addf %163, %166 : vector<4x8xf32>
    %168 = vector.extract_strided_slice %15 {offsets = [8, 0], sizes = [4, 8], strides = [1, 1]} : vector<32x8xf32> to vector<4x8xf32>
    %169 = arith.mulf %168, %18 : vector<4x8xf32>
    %cst_26 = arith.constant dense<0.000000e+00> : vector<8xf32>
    %170 = vector.multi_reduction <add>, %169, %cst_26 [0] : vector<4x8xf32> to vector<8xf32>
    %171 = vector.shape_cast %170 : vector<8xf32> to vector<1x8xf32>
    %172 = arith.mulf %168, %19 : vector<4x8xf32>
    %cst_27 = arith.constant dense<0.000000e+00> : vector<8xf32>
    %173 = vector.multi_reduction <add>, %172, %cst_27 [0] : vector<4x8xf32> to vector<8xf32>
    %174 = vector.shape_cast %173 : vector<8xf32> to vector<1x8xf32>
    %175 = arith.mulf %168, %20 : vector<4x8xf32>
    %cst_28 = arith.constant dense<0.000000e+00> : vector<8xf32>
    %176 = vector.multi_reduction <add>, %175, %cst_28 [0] : vector<4x8xf32> to vector<8xf32>
    %177 = vector.shape_cast %176 : vector<8xf32> to vector<1x8xf32>
    %178 = arith.mulf %168, %21 : vector<4x8xf32>
    %cst_29 = arith.constant dense<0.000000e+00> : vector<8xf32>
    %179 = vector.multi_reduction <add>, %178, %cst_29 [0] : vector<4x8xf32> to vector<8xf32>
    %180 = vector.shape_cast %179 : vector<8xf32> to vector<1x8xf32>
    %181 = arith.mulf %168, %22 : vector<4x8xf32>
    %cst_30 = arith.constant dense<0.000000e+00> : vector<8xf32>
    %182 = vector.multi_reduction <add>, %181, %cst_30 [0] : vector<4x8xf32> to vector<8xf32>
    %183 = vector.shape_cast %182 : vector<8xf32> to vector<1x8xf32>
    %184 = arith.mulf %168, %23 : vector<4x8xf32>
    %cst_31 = arith.constant dense<0.000000e+00> : vector<8xf32>
    %185 = vector.multi_reduction <add>, %184, %cst_31 [0] : vector<4x8xf32> to vector<8xf32>
    %186 = vector.shape_cast %185 : vector<8xf32> to vector<1x8xf32>
    %187 = arith.mulf %168, %24 : vector<4x8xf32>
    %cst_32 = arith.constant dense<0.000000e+00> : vector<8xf32>
    %188 = vector.multi_reduction <add>, %187, %cst_32 [0] : vector<4x8xf32> to vector<8xf32>
    %189 = vector.shape_cast %188 : vector<8xf32> to vector<1x8xf32>
    %190 = arith.mulf %168, %25 : vector<4x8xf32>
    %cst_33 = arith.constant dense<0.000000e+00> : vector<8xf32>
    %191 = vector.multi_reduction <add>, %190, %cst_33 [0] : vector<4x8xf32> to vector<8xf32>
    %192 = vector.shape_cast %191 : vector<8xf32> to vector<1x8xf32>
    %193 = tpu.concatenate %171, %174, %177, %180, %183, %186, %189, %192 in 0 : vector<1x8xf32>, vector<1x8xf32>, vector<1x8xf32>, vector<1x8xf32>, vector<1x8xf32>, vector<1x8xf32>, vector<1x8xf32>, vector<1x8xf32> -> vector<8x8xf32>
    %cst_34 = arith.constant dense<0xFF800000> : vector<8xf32>
    %194 = vector.multi_reduction <maximumf>, %193, %cst_34 [0] : vector<8x8xf32> to vector<8xf32>
    %195 = vector.shape_cast %194 : vector<8xf32> to vector<1x8xf32>
    %196 = vector.broadcast %195 : vector<1x8xf32> to vector<8x8xf32>
    %197 = arith.subf %193, %196 : vector<8x8xf32>
    %198 = math.exp %197 : vector<8x8xf32>
    %cst_35 = arith.constant dense<0.000000e+00> : vector<8xf32>
    %199 = vector.multi_reduction <add>, %198, %cst_35 [0] : vector<8x8xf32> to vector<8xf32>
    %200 = vector.shape_cast %199 : vector<8xf32> to vector<1x8xf32>
    %201 = tpu.reciprocal %200 {approx = true} : vector<1x8xf32> -> vector<1x8xf32>
    %202 = vector.broadcast %201 : vector<1x8xf32> to vector<8x8xf32>
    %203 = arith.mulf %198, %202 : vector<8x8xf32>
    %204 = vector.extract_strided_slice %203 {offsets = [0, 0], sizes = [1, 8], strides = [1, 1]} : vector<8x8xf32> to vector<1x8xf32>
    %205 = vector.broadcast %204 : vector<1x8xf32> to vector<4x8xf32>
    %206 = arith.mulf %205, %26 : vector<4x8xf32>
    %207 = vector.extract_strided_slice %203 {offsets = [1, 0], sizes = [1, 8], strides = [1, 1]} : vector<8x8xf32> to vector<1x8xf32>
    %208 = vector.broadcast %207 : vector<1x8xf32> to vector<4x8xf32>
    %209 = arith.mulf %208, %27 : vector<4x8xf32>
    %210 = arith.addf %206, %209 : vector<4x8xf32>
    %211 = vector.extract_strided_slice %203 {offsets = [2, 0], sizes = [1, 8], strides = [1, 1]} : vector<8x8xf32> to vector<1x8xf32>
    %212 = vector.broadcast %211 : vector<1x8xf32> to vector<4x8xf32>
    %213 = arith.mulf %212, %28 : vector<4x8xf32>
    %214 = arith.addf %210, %213 : vector<4x8xf32>
    %215 = vector.extract_strided_slice %203 {offsets = [3, 0], sizes = [1, 8], strides = [1, 1]} : vector<8x8xf32> to vector<1x8xf32>
    %216 = vector.broadcast %215 : vector<1x8xf32> to vector<4x8xf32>
    %217 = arith.mulf %216, %29 : vector<4x8xf32>
    %218 = arith.addf %214, %217 : vector<4x8xf32>
    %219 = vector.extract_strided_slice %203 {offsets = [4, 0], sizes = [1, 8], strides = [1, 1]} : vector<8x8xf32> to vector<1x8xf32>
    %220 = vector.broadcast %219 : vector<1x8xf32> to vector<4x8xf32>
    %221 = arith.mulf %220, %30 : vector<4x8xf32>
    %222 = arith.addf %218, %221 : vector<4x8xf32>
    %223 = vector.extract_strided_slice %203 {offsets = [5, 0], sizes = [1, 8], strides = [1, 1]} : vector<8x8xf32> to vector<1x8xf32>
    %224 = vector.broadcast %223 : vector<1x8xf32> to vector<4x8xf32>
    %225 = arith.mulf %224, %31 : vector<4x8xf32>
    %226 = arith.addf %222, %225 : vector<4x8xf32>
    %227 = vector.extract_strided_slice %203 {offsets = [6, 0], sizes = [1, 8], strides = [1, 1]} : vector<8x8xf32> to vector<1x8xf32>
    %228 = vector.broadcast %227 : vector<1x8xf32> to vector<4x8xf32>
    %229 = arith.mulf %228, %32 : vector<4x8xf32>
    %230 = arith.addf %226, %229 : vector<4x8xf32>
    %231 = vector.extract_strided_slice %203 {offsets = [7, 0], sizes = [1, 8], strides = [1, 1]} : vector<8x8xf32> to vector<1x8xf32>
    %232 = vector.broadcast %231 : vector<1x8xf32> to vector<4x8xf32>
    %233 = arith.mulf %232, %33 : vector<4x8xf32>
    %234 = arith.addf %230, %233 : vector<4x8xf32>
    %235 = vector.extract_strided_slice %15 {offsets = [12, 0], sizes = [4, 8], strides = [1, 1]} : vector<32x8xf32> to vector<4x8xf32>
    %236 = arith.mulf %235, %18 : vector<4x8xf32>
    %cst_36 = arith.constant dense<0.000000e+00> : vector<8xf32>
    %237 = vector.multi_reduction <add>, %236, %cst_36 [0] : vector<4x8xf32> to vector<8xf32>
    %238 = vector.shape_cast %237 : vector<8xf32> to vector<1x8xf32>
    %239 = arith.mulf %235, %19 : vector<4x8xf32>
    %cst_37 = arith.constant dense<0.000000e+00> : vector<8xf32>
    %240 = vector.multi_reduction <add>, %239, %cst_37 [0] : vector<4x8xf32> to vector<8xf32>
    %241 = vector.shape_cast %240 : vector<8xf32> to vector<1x8xf32>
    %242 = arith.mulf %235, %20 : vector<4x8xf32>
    %cst_38 = arith.constant dense<0.000000e+00> : vector<8xf32>
    %243 = vector.multi_reduction <add>, %242, %cst_38 [0] : vector<4x8xf32> to vector<8xf32>
    %244 = vector.shape_cast %243 : vector<8xf32> to vector<1x8xf32>
    %245 = arith.mulf %235, %21 : vector<4x8xf32>
    %cst_39 = arith.constant dense<0.000000e+00> : vector<8xf32>
    %246 = vector.multi_reduction <add>, %245, %cst_39 [0] : vector<4x8xf32> to vector<8xf32>
    %247 = vector.shape_cast %246 : vector<8xf32> to vector<1x8xf32>
    %248 = arith.mulf %235, %22 : vector<4x8xf32>
    %cst_40 = arith.constant dense<0.000000e+00> : vector<8xf32>
    %249 = vector.multi_reduction <add>, %248, %cst_40 [0] : vector<4x8xf32> to vector<8xf32>
    %250 = vector.shape_cast %249 : vector<8xf32> to vector<1x8xf32>
    %251 = arith.mulf %235, %23 : vector<4x8xf32>
    %cst_41 = arith.constant dense<0.000000e+00> : vector<8xf32>
    %252 = vector.multi_reduction <add>, %251, %cst_41 [0] : vector<4x8xf32> to vector<8xf32>
    %253 = vector.shape_cast %252 : vector<8xf32> to vector<1x8xf32>
    %254 = arith.mulf %235, %24 : vector<4x8xf32>
    %cst_42 = arith.constant dense<0.000000e+00> : vector<8xf32>
    %255 = vector.multi_reduction <add>, %254, %cst_42 [0] : vector<4x8xf32> to vector<8xf32>
    %256 = vector.shape_cast %255 : vector<8xf32> to vector<1x8xf32>
    %257 = arith.mulf %235, %25 : vector<4x8xf32>
    %cst_43 = arith.constant dense<0.000000e+00> : vector<8xf32>
    %258 = vector.multi_reduction <add>, %257, %cst_43 [0] : vector<4x8xf32> to vector<8xf32>
    %259 = vector.shape_cast %258 : vector<8xf32> to vector<1x8xf32>
    %260 = tpu.concatenate %238, %241, %244, %247, %250, %253, %256, %259 in 0 : vector<1x8xf32>, vector<1x8xf32>, vector<1x8xf32>, vector<1x8xf32>, vector<1x8xf32>, vector<1x8xf32>, vector<1x8xf32>, vector<1x8xf32> -> vector<8x8xf32>
    %cst_44 = arith.constant dense<0xFF800000> : vector<8xf32>
    %261 = vector.multi_reduction <maximumf>, %260, %cst_44 [0] : vector<8x8xf32> to vector<8xf32>
    %262 = vector.shape_cast %261 : vector<8xf32> to vector<1x8xf32>
    %263 = vector.broadcast %262 : vector<1x8xf32> to vector<8x8xf32>
    %264 = arith.subf %260, %263 : vector<8x8xf32>
    %265 = math.exp %264 : vector<8x8xf32>
    %cst_45 = arith.constant dense<0.000000e+00> : vector<8xf32>
    %266 = vector.multi_reduction <add>, %265, %cst_45 [0] : vector<8x8xf32> to vector<8xf32>
    %267 = vector.shape_cast %266 : vector<8xf32> to vector<1x8xf32>
    %268 = tpu.reciprocal %267 {approx = true} : vector<1x8xf32> -> vector<1x8xf32>
    %269 = vector.broadcast %268 : vector<1x8xf32> to vector<8x8xf32>
    %270 = arith.mulf %265, %269 : vector<8x8xf32>
    %271 = vector.extract_strided_slice %270 {offsets = [0, 0], sizes = [1, 8], strides = [1, 1]} : vector<8x8xf32> to vector<1x8xf32>
    %272 = vector.broadcast %271 : vector<1x8xf32> to vector<4x8xf32>
    %273 = arith.mulf %272, %26 : vector<4x8xf32>
    %274 = vector.extract_strided_slice %270 {offsets = [1, 0], sizes = [1, 8], strides = [1, 1]} : vector<8x8xf32> to vector<1x8xf32>
    %275 = vector.broadcast %274 : vector<1x8xf32> to vector<4x8xf32>
    %276 = arith.mulf %275, %27 : vector<4x8xf32>
    %277 = arith.addf %273, %276 : vector<4x8xf32>
    %278 = vector.extract_strided_slice %270 {offsets = [2, 0], sizes = [1, 8], strides = [1, 1]} : vector<8x8xf32> to vector<1x8xf32>
    %279 = vector.broadcast %278 : vector<1x8xf32> to vector<4x8xf32>
    %280 = arith.mulf %279, %28 : vector<4x8xf32>
    %281 = arith.addf %277, %280 : vector<4x8xf32>
    %282 = vector.extract_strided_slice %270 {offsets = [3, 0], sizes = [1, 8], strides = [1, 1]} : vector<8x8xf32> to vector<1x8xf32>
    %283 = vector.broadcast %282 : vector<1x8xf32> to vector<4x8xf32>
    %284 = arith.mulf %283, %29 : vector<4x8xf32>
    %285 = arith.addf %281, %284 : vector<4x8xf32>
    %286 = vector.extract_strided_slice %270 {offsets = [4, 0], sizes = [1, 8], strides = [1, 1]} : vector<8x8xf32> to vector<1x8xf32>
    %287 = vector.broadcast %286 : vector<1x8xf32> to vector<4x8xf32>
    %288 = arith.mulf %287, %30 : vector<4x8xf32>
    %289 = arith.addf %285, %288 : vector<4x8xf32>
    %290 = vector.extract_strided_slice %270 {offsets = [5, 0], sizes = [1, 8], strides = [1, 1]} : vector<8x8xf32> to vector<1x8xf32>
    %291 = vector.broadcast %290 : vector<1x8xf32> to vector<4x8xf32>
    %292 = arith.mulf %291, %31 : vector<4x8xf32>
    %293 = arith.addf %289, %292 : vector<4x8xf32>
    %294 = vector.extract_strided_slice %270 {offsets = [6, 0], sizes = [1, 8], strides = [1, 1]} : vector<8x8xf32> to vector<1x8xf32>
    %295 = vector.broadcast %294 : vector<1x8xf32> to vector<4x8xf32>
    %296 = arith.mulf %295, %32 : vector<4x8xf32>
    %297 = arith.addf %293, %296 : vector<4x8xf32>
    %298 = vector.extract_strided_slice %270 {offsets = [7, 0], sizes = [1, 8], strides = [1, 1]} : vector<8x8xf32> to vector<1x8xf32>
    %299 = vector.broadcast %298 : vector<1x8xf32> to vector<4x8xf32>
    %300 = arith.mulf %299, %33 : vector<4x8xf32>
    %301 = arith.addf %297, %300 : vector<4x8xf32>
    %302 = vector.extract_strided_slice %15 {offsets = [16, 0], sizes = [4, 8], strides = [1, 1]} : vector<32x8xf32> to vector<4x8xf32>
    %303 = arith.mulf %302, %18 : vector<4x8xf32>
    %cst_46 = arith.constant dense<0.000000e+00> : vector<8xf32>
    %304 = vector.multi_reduction <add>, %303, %cst_46 [0] : vector<4x8xf32> to vector<8xf32>
    %305 = vector.shape_cast %304 : vector<8xf32> to vector<1x8xf32>
    %306 = arith.mulf %302, %19 : vector<4x8xf32>
    %cst_47 = arith.constant dense<0.000000e+00> : vector<8xf32>
    %307 = vector.multi_reduction <add>, %306, %cst_47 [0] : vector<4x8xf32> to vector<8xf32>
    %308 = vector.shape_cast %307 : vector<8xf32> to vector<1x8xf32>
    %309 = arith.mulf %302, %20 : vector<4x8xf32>
    %cst_48 = arith.constant dense<0.000000e+00> : vector<8xf32>
    %310 = vector.multi_reduction <add>, %309, %cst_48 [0] : vector<4x8xf32> to vector<8xf32>
    %311 = vector.shape_cast %310 : vector<8xf32> to vector<1x8xf32>
    %312 = arith.mulf %302, %21 : vector<4x8xf32>
    %cst_49 = arith.constant dense<0.000000e+00> : vector<8xf32>
    %313 = vector.multi_reduction <add>, %312, %cst_49 [0] : vector<4x8xf32> to vector<8xf32>
    %314 = vector.shape_cast %313 : vector<8xf32> to vector<1x8xf32>
    %315 = arith.mulf %302, %22 : vector<4x8xf32>
    %cst_50 = arith.constant dense<0.000000e+00> : vector<8xf32>
    %316 = vector.multi_reduction <add>, %315, %cst_50 [0] : vector<4x8xf32> to vector<8xf32>
    %317 = vector.shape_cast %316 : vector<8xf32> to vector<1x8xf32>
    %318 = arith.mulf %302, %23 : vector<4x8xf32>
    %cst_51 = arith.constant dense<0.000000e+00> : vector<8xf32>
    %319 = vector.multi_reduction <add>, %318, %cst_51 [0] : vector<4x8xf32> to vector<8xf32>
    %320 = vector.shape_cast %319 : vector<8xf32> to vector<1x8xf32>
    %321 = arith.mulf %302, %24 : vector<4x8xf32>
    %cst_52 = arith.constant dense<0.000000e+00> : vector<8xf32>
    %322 = vector.multi_reduction <add>, %321, %cst_52 [0] : vector<4x8xf32> to vector<8xf32>
    %323 = vector.shape_cast %322 : vector<8xf32> to vector<1x8xf32>
    %324 = arith.mulf %302, %25 : vector<4x8xf32>
    %cst_53 = arith.constant dense<0.000000e+00> : vector<8xf32>
    %325 = vector.multi_reduction <add>, %324, %cst_53 [0] : vector<4x8xf32> to vector<8xf32>
    %326 = vector.shape_cast %325 : vector<8xf32> to vector<1x8xf32>
    %327 = tpu.concatenate %305, %308, %311, %314, %317, %320, %323, %326 in 0 : vector<1x8xf32>, vector<1x8xf32>, vector<1x8xf32>, vector<1x8xf32>, vector<1x8xf32>, vector<1x8xf32>, vector<1x8xf32>, vector<1x8xf32> -> vector<8x8xf32>
    %cst_54 = arith.constant dense<0xFF800000> : vector<8xf32>
    %328 = vector.multi_reduction <maximumf>, %327, %cst_54 [0] : vector<8x8xf32> to vector<8xf32>
    %329 = vector.shape_cast %328 : vector<8xf32> to vector<1x8xf32>
    %330 = vector.broadcast %329 : vector<1x8xf32> to vector<8x8xf32>
    %331 = arith.subf %327, %330 : vector<8x8xf32>
    %332 = math.exp %331 : vector<8x8xf32>
    %cst_55 = arith.constant dense<0.000000e+00> : vector<8xf32>
    %333 = vector.multi_reduction <add>, %332, %cst_55 [0] : vector<8x8xf32> to vector<8xf32>
    %334 = vector.shape_cast %333 : vector<8xf32> to vector<1x8xf32>
    %335 = tpu.reciprocal %334 {approx = true} : vector<1x8xf32> -> vector<1x8xf32>
    %336 = vector.broadcast %335 : vector<1x8xf32> to vector<8x8xf32>
    %337 = arith.mulf %332, %336 : vector<8x8xf32>
    %338 = vector.extract_strided_slice %337 {offsets = [0, 0], sizes = [1, 8], strides = [1, 1]} : vector<8x8xf32> to vector<1x8xf32>
    %339 = vector.broadcast %338 : vector<1x8xf32> to vector<4x8xf32>
    %340 = arith.mulf %339, %26 : vector<4x8xf32>
    %341 = vector.extract_strided_slice %337 {offsets = [1, 0], sizes = [1, 8], strides = [1, 1]} : vector<8x8xf32> to vector<1x8xf32>
    %342 = vector.broadcast %341 : vector<1x8xf32> to vector<4x8xf32>
    %343 = arith.mulf %342, %27 : vector<4x8xf32>
    %344 = arith.addf %340, %343 : vector<4x8xf32>
    %345 = vector.extract_strided_slice %337 {offsets = [2, 0], sizes = [1, 8], strides = [1, 1]} : vector<8x8xf32> to vector<1x8xf32>
    %346 = vector.broadcast %345 : vector<1x8xf32> to vector<4x8xf32>
    %347 = arith.mulf %346, %28 : vector<4x8xf32>
    %348 = arith.addf %344, %347 : vector<4x8xf32>
    %349 = vector.extract_strided_slice %337 {offsets = [3, 0], sizes = [1, 8], strides = [1, 1]} : vector<8x8xf32> to vector<1x8xf32>
    %350 = vector.broadcast %349 : vector<1x8xf32> to vector<4x8xf32>
    %351 = arith.mulf %350, %29 : vector<4x8xf32>
    %352 = arith.addf %348, %351 : vector<4x8xf32>
    %353 = vector.extract_strided_slice %337 {offsets = [4, 0], sizes = [1, 8], strides = [1, 1]} : vector<8x8xf32> to vector<1x8xf32>
    %354 = vector.broadcast %353 : vector<1x8xf32> to vector<4x8xf32>
    %355 = arith.mulf %354, %30 : vector<4x8xf32>
    %356 = arith.addf %352, %355 : vector<4x8xf32>
    %357 = vector.extract_strided_slice %337 {offsets = [5, 0], sizes = [1, 8], strides = [1, 1]} : vector<8x8xf32> to vector<1x8xf32>
    %358 = vector.broadcast %357 : vector<1x8xf32> to vector<4x8xf32>
    %359 = arith.mulf %358, %31 : vector<4x8xf32>
    %360 = arith.addf %356, %359 : vector<4x8xf32>
    %361 = vector.extract_strided_slice %337 {offsets = [6, 0], sizes = [1, 8], strides = [1, 1]} : vector<8x8xf32> to vector<1x8xf32>
    %362 = vector.broadcast %361 : vector<1x8xf32> to vector<4x8xf32>
    %363 = arith.mulf %362, %32 : vector<4x8xf32>
    %364 = arith.addf %360, %363 : vector<4x8xf32>
    %365 = vector.extract_strided_slice %337 {offsets = [7, 0], sizes = [1, 8], strides = [1, 1]} : vector<8x8xf32> to vector<1x8xf32>
    %366 = vector.broadcast %365 : vector<1x8xf32> to vector<4x8xf32>
    %367 = arith.mulf %366, %33 : vector<4x8xf32>
    %368 = arith.addf %364, %367 : vector<4x8xf32>
    %369 = vector.extract_strided_slice %15 {offsets = [20, 0], sizes = [4, 8], strides = [1, 1]} : vector<32x8xf32> to vector<4x8xf32>
    %370 = arith.mulf %369, %18 : vector<4x8xf32>
    %cst_56 = arith.constant dense<0.000000e+00> : vector<8xf32>
    %371 = vector.multi_reduction <add>, %370, %cst_56 [0] : vector<4x8xf32> to vector<8xf32>
    %372 = vector.shape_cast %371 : vector<8xf32> to vector<1x8xf32>
    %373 = arith.mulf %369, %19 : vector<4x8xf32>
    %cst_57 = arith.constant dense<0.000000e+00> : vector<8xf32>
    %374 = vector.multi_reduction <add>, %373, %cst_57 [0] : vector<4x8xf32> to vector<8xf32>
    %375 = vector.shape_cast %374 : vector<8xf32> to vector<1x8xf32>
    %376 = arith.mulf %369, %20 : vector<4x8xf32>
    %cst_58 = arith.constant dense<0.000000e+00> : vector<8xf32>
    %377 = vector.multi_reduction <add>, %376, %cst_58 [0] : vector<4x8xf32> to vector<8xf32>
    %378 = vector.shape_cast %377 : vector<8xf32> to vector<1x8xf32>
    %379 = arith.mulf %369, %21 : vector<4x8xf32>
    %cst_59 = arith.constant dense<0.000000e+00> : vector<8xf32>
    %380 = vector.multi_reduction <add>, %379, %cst_59 [0] : vector<4x8xf32> to vector<8xf32>
    %381 = vector.shape_cast %380 : vector<8xf32> to vector<1x8xf32>
    %382 = arith.mulf %369, %22 : vector<4x8xf32>
    %cst_60 = arith.constant dense<0.000000e+00> : vector<8xf32>
    %383 = vector.multi_reduction <add>, %382, %cst_60 [0] : vector<4x8xf32> to vector<8xf32>
    %384 = vector.shape_cast %383 : vector<8xf32> to vector<1x8xf32>
    %385 = arith.mulf %369, %23 : vector<4x8xf32>
    %cst_61 = arith.constant dense<0.000000e+00> : vector<8xf32>
    %386 = vector.multi_reduction <add>, %385, %cst_61 [0] : vector<4x8xf32> to vector<8xf32>
    %387 = vector.shape_cast %386 : vector<8xf32> to vector<1x8xf32>
    %388 = arith.mulf %369, %24 : vector<4x8xf32>
    %cst_62 = arith.constant dense<0.000000e+00> : vector<8xf32>
    %389 = vector.multi_reduction <add>, %388, %cst_62 [0] : vector<4x8xf32> to vector<8xf32>
    %390 = vector.shape_cast %389 : vector<8xf32> to vector<1x8xf32>
    %391 = arith.mulf %369, %25 : vector<4x8xf32>
    %cst_63 = arith.constant dense<0.000000e+00> : vector<8xf32>
    %392 = vector.multi_reduction <add>, %391, %cst_63 [0] : vector<4x8xf32> to vector<8xf32>
    %393 = vector.shape_cast %392 : vector<8xf32> to vector<1x8xf32>
    %394 = tpu.concatenate %372, %375, %378, %381, %384, %387, %390, %393 in 0 : vector<1x8xf32>, vector<1x8xf32>, vector<1x8xf32>, vector<1x8xf32>, vector<1x8xf32>, vector<1x8xf32>, vector<1x8xf32>, vector<1x8xf32> -> vector<8x8xf32>
    %cst_64 = arith.constant dense<0xFF800000> : vector<8xf32>
    %395 = vector.multi_reduction <maximumf>, %394, %cst_64 [0] : vector<8x8xf32> to vector<8xf32>
    %396 = vector.shape_cast %395 : vector<8xf32> to vector<1x8xf32>
    %397 = vector.broadcast %396 : vector<1x8xf32> to vector<8x8xf32>
    %398 = arith.subf %394, %397 : vector<8x8xf32>
    %399 = math.exp %398 : vector<8x8xf32>
    %cst_65 = arith.constant dense<0.000000e+00> : vector<8xf32>
    %400 = vector.multi_reduction <add>, %399, %cst_65 [0] : vector<8x8xf32> to vector<8xf32>
    %401 = vector.shape_cast %400 : vector<8xf32> to vector<1x8xf32>
    %402 = tpu.reciprocal %401 {approx = true} : vector<1x8xf32> -> vector<1x8xf32>
    %403 = vector.broadcast %402 : vector<1x8xf32> to vector<8x8xf32>
    %404 = arith.mulf %399, %403 : vector<8x8xf32>
    %405 = vector.extract_strided_slice %404 {offsets = [0, 0], sizes = [1, 8], strides = [1, 1]} : vector<8x8xf32> to vector<1x8xf32>
    %406 = vector.broadcast %405 : vector<1x8xf32> to vector<4x8xf32>
    %407 = arith.mulf %406, %26 : vector<4x8xf32>
    %408 = vector.extract_strided_slice %404 {offsets = [1, 0], sizes = [1, 8], strides = [1, 1]} : vector<8x8xf32> to vector<1x8xf32>
    %409 = vector.broadcast %408 : vector<1x8xf32> to vector<4x8xf32>
    %410 = arith.mulf %409, %27 : vector<4x8xf32>
    %411 = arith.addf %407, %410 : vector<4x8xf32>
    %412 = vector.extract_strided_slice %404 {offsets = [2, 0], sizes = [1, 8], strides = [1, 1]} : vector<8x8xf32> to vector<1x8xf32>
    %413 = vector.broadcast %412 : vector<1x8xf32> to vector<4x8xf32>
    %414 = arith.mulf %413, %28 : vector<4x8xf32>
    %415 = arith.addf %411, %414 : vector<4x8xf32>
    %416 = vector.extract_strided_slice %404 {offsets = [3, 0], sizes = [1, 8], strides = [1, 1]} : vector<8x8xf32> to vector<1x8xf32>
    %417 = vector.broadcast %416 : vector<1x8xf32> to vector<4x8xf32>
    %418 = arith.mulf %417, %29 : vector<4x8xf32>
    %419 = arith.addf %415, %418 : vector<4x8xf32>
    %420 = vector.extract_strided_slice %404 {offsets = [4, 0], sizes = [1, 8], strides = [1, 1]} : vector<8x8xf32> to vector<1x8xf32>
    %421 = vector.broadcast %420 : vector<1x8xf32> to vector<4x8xf32>
    %422 = arith.mulf %421, %30 : vector<4x8xf32>
    %423 = arith.addf %419, %422 : vector<4x8xf32>
    %424 = vector.extract_strided_slice %404 {offsets = [5, 0], sizes = [1, 8], strides = [1, 1]} : vector<8x8xf32> to vector<1x8xf32>
    %425 = vector.broadcast %424 : vector<1x8xf32> to vector<4x8xf32>
    %426 = arith.mulf %425, %31 : vector<4x8xf32>
    %427 = arith.addf %423, %426 : vector<4x8xf32>
    %428 = vector.extract_strided_slice %404 {offsets = [6, 0], sizes = [1, 8], strides = [1, 1]} : vector<8x8xf32> to vector<1x8xf32>
    %429 = vector.broadcast %428 : vector<1x8xf32> to vector<4x8xf32>
    %430 = arith.mulf %429, %32 : vector<4x8xf32>
    %431 = arith.addf %427, %430 : vector<4x8xf32>
    %432 = vector.extract_strided_slice %404 {offsets = [7, 0], sizes = [1, 8], strides = [1, 1]} : vector<8x8xf32> to vector<1x8xf32>
    %433 = vector.broadcast %432 : vector<1x8xf32> to vector<4x8xf32>
    %434 = arith.mulf %433, %33 : vector<4x8xf32>
    %435 = arith.addf %431, %434 : vector<4x8xf32>
    %436 = vector.extract_strided_slice %15 {offsets = [24, 0], sizes = [4, 8], strides = [1, 1]} : vector<32x8xf32> to vector<4x8xf32>
    %437 = arith.mulf %436, %18 : vector<4x8xf32>
    %cst_66 = arith.constant dense<0.000000e+00> : vector<8xf32>
    %438 = vector.multi_reduction <add>, %437, %cst_66 [0] : vector<4x8xf32> to vector<8xf32>
    %439 = vector.shape_cast %438 : vector<8xf32> to vector<1x8xf32>
    %440 = arith.mulf %436, %19 : vector<4x8xf32>
    %cst_67 = arith.constant dense<0.000000e+00> : vector<8xf32>
    %441 = vector.multi_reduction <add>, %440, %cst_67 [0] : vector<4x8xf32> to vector<8xf32>
    %442 = vector.shape_cast %441 : vector<8xf32> to vector<1x8xf32>
    %443 = arith.mulf %436, %20 : vector<4x8xf32>
    %cst_68 = arith.constant dense<0.000000e+00> : vector<8xf32>
    %444 = vector.multi_reduction <add>, %443, %cst_68 [0] : vector<4x8xf32> to vector<8xf32>
    %445 = vector.shape_cast %444 : vector<8xf32> to vector<1x8xf32>
    %446 = arith.mulf %436, %21 : vector<4x8xf32>
    %cst_69 = arith.constant dense<0.000000e+00> : vector<8xf32>
    %447 = vector.multi_reduction <add>, %446, %cst_69 [0] : vector<4x8xf32> to vector<8xf32>
    %448 = vector.shape_cast %447 : vector<8xf32> to vector<1x8xf32>
    %449 = arith.mulf %436, %22 : vector<4x8xf32>
    %cst_70 = arith.constant dense<0.000000e+00> : vector<8xf32>
    %450 = vector.multi_reduction <add>, %449, %cst_70 [0] : vector<4x8xf32> to vector<8xf32>
    %451 = vector.shape_cast %450 : vector<8xf32> to vector<1x8xf32>
    %452 = arith.mulf %436, %23 : vector<4x8xf32>
    %cst_71 = arith.constant dense<0.000000e+00> : vector<8xf32>
    %453 = vector.multi_reduction <add>, %452, %cst_71 [0] : vector<4x8xf32> to vector<8xf32>
    %454 = vector.shape_cast %453 : vector<8xf32> to vector<1x8xf32>
    %455 = arith.mulf %436, %24 : vector<4x8xf32>
    %cst_72 = arith.constant dense<0.000000e+00> : vector<8xf32>
    %456 = vector.multi_reduction <add>, %455, %cst_72 [0] : vector<4x8xf32> to vector<8xf32>
    %457 = vector.shape_cast %456 : vector<8xf32> to vector<1x8xf32>
    %458 = arith.mulf %436, %25 : vector<4x8xf32>
    %cst_73 = arith.constant dense<0.000000e+00> : vector<8xf32>
    %459 = vector.multi_reduction <add>, %458, %cst_73 [0] : vector<4x8xf32> to vector<8xf32>
    %460 = vector.shape_cast %459 : vector<8xf32> to vector<1x8xf32>
    %461 = tpu.concatenate %439, %442, %445, %448, %451, %454, %457, %460 in 0 : vector<1x8xf32>, vector<1x8xf32>, vector<1x8xf32>, vector<1x8xf32>, vector<1x8xf32>, vector<1x8xf32>, vector<1x8xf32>, vector<1x8xf32> -> vector<8x8xf32>
    %cst_74 = arith.constant dense<0xFF800000> : vector<8xf32>
    %462 = vector.multi_reduction <maximumf>, %461, %cst_74 [0] : vector<8x8xf32> to vector<8xf32>
    %463 = vector.shape_cast %462 : vector<8xf32> to vector<1x8xf32>
    %464 = vector.broadcast %463 : vector<1x8xf32> to vector<8x8xf32>
    %465 = arith.subf %461, %464 : vector<8x8xf32>
    %466 = math.exp %465 : vector<8x8xf32>
    %cst_75 = arith.constant dense<0.000000e+00> : vector<8xf32>
    %467 = vector.multi_reduction <add>, %466, %cst_75 [0] : vector<8x8xf32> to vector<8xf32>
    %468 = vector.shape_cast %467 : vector<8xf32> to vector<1x8xf32>
    %469 = tpu.reciprocal %468 {approx = true} : vector<1x8xf32> -> vector<1x8xf32>
    %470 = vector.broadcast %469 : vector<1x8xf32> to vector<8x8xf32>
    %471 = arith.mulf %466, %470 : vector<8x8xf32>
    %472 = vector.extract_strided_slice %471 {offsets = [0, 0], sizes = [1, 8], strides = [1, 1]} : vector<8x8xf32> to vector<1x8xf32>
    %473 = vector.broadcast %472 : vector<1x8xf32> to vector<4x8xf32>
    %474 = arith.mulf %473, %26 : vector<4x8xf32>
    %475 = vector.extract_strided_slice %471 {offsets = [1, 0], sizes = [1, 8], strides = [1, 1]} : vector<8x8xf32> to vector<1x8xf32>
    %476 = vector.broadcast %475 : vector<1x8xf32> to vector<4x8xf32>
    %477 = arith.mulf %476, %27 : vector<4x8xf32>
    %478 = arith.addf %474, %477 : vector<4x8xf32>
    %479 = vector.extract_strided_slice %471 {offsets = [2, 0], sizes = [1, 8], strides = [1, 1]} : vector<8x8xf32> to vector<1x8xf32>
    %480 = vector.broadcast %479 : vector<1x8xf32> to vector<4x8xf32>
    %481 = arith.mulf %480, %28 : vector<4x8xf32>
    %482 = arith.addf %478, %481 : vector<4x8xf32>
    %483 = vector.extract_strided_slice %471 {offsets = [3, 0], sizes = [1, 8], strides = [1, 1]} : vector<8x8xf32> to vector<1x8xf32>
    %484 = vector.broadcast %483 : vector<1x8xf32> to vector<4x8xf32>
    %485 = arith.mulf %484, %29 : vector<4x8xf32>
    %486 = arith.addf %482, %485 : vector<4x8xf32>
    %487 = vector.extract_strided_slice %471 {offsets = [4, 0], sizes = [1, 8], strides = [1, 1]} : vector<8x8xf32> to vector<1x8xf32>
    %488 = vector.broadcast %487 : vector<1x8xf32> to vector<4x8xf32>
    %489 = arith.mulf %488, %30 : vector<4x8xf32>
    %490 = arith.addf %486, %489 : vector<4x8xf32>
    %491 = vector.extract_strided_slice %471 {offsets = [5, 0], sizes = [1, 8], strides = [1, 1]} : vector<8x8xf32> to vector<1x8xf32>
    %492 = vector.broadcast %491 : vector<1x8xf32> to vector<4x8xf32>
    %493 = arith.mulf %492, %31 : vector<4x8xf32>
    %494 = arith.addf %490, %493 : vector<4x8xf32>
    %495 = vector.extract_strided_slice %471 {offsets = [6, 0], sizes = [1, 8], strides = [1, 1]} : vector<8x8xf32> to vector<1x8xf32>
    %496 = vector.broadcast %495 : vector<1x8xf32> to vector<4x8xf32>
    %497 = arith.mulf %496, %32 : vector<4x8xf32>
    %498 = arith.addf %494, %497 : vector<4x8xf32>
    %499 = vector.extract_strided_slice %471 {offsets = [7, 0], sizes = [1, 8], strides = [1, 1]} : vector<8x8xf32> to vector<1x8xf32>
    %500 = vector.broadcast %499 : vector<1x8xf32> to vector<4x8xf32>
    %501 = arith.mulf %500, %33 : vector<4x8xf32>
    %502 = arith.addf %498, %501 : vector<4x8xf32>
    %503 = vector.extract_strided_slice %15 {offsets = [28, 0], sizes = [4, 8], strides = [1, 1]} : vector<32x8xf32> to vector<4x8xf32>
    %504 = arith.mulf %503, %18 : vector<4x8xf32>
    %cst_76 = arith.constant dense<0.000000e+00> : vector<8xf32>
    %505 = vector.multi_reduction <add>, %504, %cst_76 [0] : vector<4x8xf32> to vector<8xf32>
    %506 = vector.shape_cast %505 : vector<8xf32> to vector<1x8xf32>
    %507 = arith.mulf %503, %19 : vector<4x8xf32>
    %cst_77 = arith.constant dense<0.000000e+00> : vector<8xf32>
    %508 = vector.multi_reduction <add>, %507, %cst_77 [0] : vector<4x8xf32> to vector<8xf32>
    %509 = vector.shape_cast %508 : vector<8xf32> to vector<1x8xf32>
    %510 = arith.mulf %503, %20 : vector<4x8xf32>
    %cst_78 = arith.constant dense<0.000000e+00> : vector<8xf32>
    %511 = vector.multi_reduction <add>, %510, %cst_78 [0] : vector<4x8xf32> to vector<8xf32>
    %512 = vector.shape_cast %511 : vector<8xf32> to vector<1x8xf32>
    %513 = arith.mulf %503, %21 : vector<4x8xf32>
    %cst_79 = arith.constant dense<0.000000e+00> : vector<8xf32>
    %514 = vector.multi_reduction <add>, %513, %cst_79 [0] : vector<4x8xf32> to vector<8xf32>
    %515 = vector.shape_cast %514 : vector<8xf32> to vector<1x8xf32>
    %516 = arith.mulf %503, %22 : vector<4x8xf32>
    %cst_80 = arith.constant dense<0.000000e+00> : vector<8xf32>
    %517 = vector.multi_reduction <add>, %516, %cst_80 [0] : vector<4x8xf32> to vector<8xf32>
    %518 = vector.shape_cast %517 : vector<8xf32> to vector<1x8xf32>
    %519 = arith.mulf %503, %23 : vector<4x8xf32>
    %cst_81 = arith.constant dense<0.000000e+00> : vector<8xf32>
    %520 = vector.multi_reduction <add>, %519, %cst_81 [0] : vector<4x8xf32> to vector<8xf32>
    %521 = vector.shape_cast %520 : vector<8xf32> to vector<1x8xf32>
    %522 = arith.mulf %503, %24 : vector<4x8xf32>
    %cst_82 = arith.constant dense<0.000000e+00> : vector<8xf32>
    %523 = vector.multi_reduction <add>, %522, %cst_82 [0] : vector<4x8xf32> to vector<8xf32>
    %524 = vector.shape_cast %523 : vector<8xf32> to vector<1x8xf32>
    %525 = arith.mulf %503, %25 : vector<4x8xf32>
    %cst_83 = arith.constant dense<0.000000e+00> : vector<8xf32>
    %526 = vector.multi_reduction <add>, %525, %cst_83 [0] : vector<4x8xf32> to vector<8xf32>
    %527 = vector.shape_cast %526 : vector<8xf32> to vector<1x8xf32>
    %528 = tpu.concatenate %506, %509, %512, %515, %518, %521, %524, %527 in 0 : vector<1x8xf32>, vector<1x8xf32>, vector<1x8xf32>, vector<1x8xf32>, vector<1x8xf32>, vector<1x8xf32>, vector<1x8xf32>, vector<1x8xf32> -> vector<8x8xf32>
    %cst_84 = arith.constant dense<0xFF800000> : vector<8xf32>
    %529 = vector.multi_reduction <maximumf>, %528, %cst_84 [0] : vector<8x8xf32> to vector<8xf32>
    %530 = vector.shape_cast %529 : vector<8xf32> to vector<1x8xf32>
    %531 = vector.broadcast %530 : vector<1x8xf32> to vector<8x8xf32>
    %532 = arith.subf %528, %531 : vector<8x8xf32>
    %533 = math.exp %532 : vector<8x8xf32>
    %cst_85 = arith.constant dense<0.000000e+00> : vector<8xf32>
    %534 = vector.multi_reduction <add>, %533, %cst_85 [0] : vector<8x8xf32> to vector<8xf32>
    %535 = vector.shape_cast %534 : vector<8xf32> to vector<1x8xf32>
    %536 = tpu.reciprocal %535 {approx = true} : vector<1x8xf32> -> vector<1x8xf32>
    %537 = vector.broadcast %536 : vector<1x8xf32> to vector<8x8xf32>
    %538 = arith.mulf %533, %537 : vector<8x8xf32>
    %539 = vector.extract_strided_slice %538 {offsets = [0, 0], sizes = [1, 8], strides = [1, 1]} : vector<8x8xf32> to vector<1x8xf32>
    %540 = vector.broadcast %539 : vector<1x8xf32> to vector<4x8xf32>
    %541 = arith.mulf %540, %26 : vector<4x8xf32>
    %542 = vector.extract_strided_slice %538 {offsets = [1, 0], sizes = [1, 8], strides = [1, 1]} : vector<8x8xf32> to vector<1x8xf32>
    %543 = vector.broadcast %542 : vector<1x8xf32> to vector<4x8xf32>
    %544 = arith.mulf %543, %27 : vector<4x8xf32>
    %545 = arith.addf %541, %544 : vector<4x8xf32>
    %546 = vector.extract_strided_slice %538 {offsets = [2, 0], sizes = [1, 8], strides = [1, 1]} : vector<8x8xf32> to vector<1x8xf32>
    %547 = vector.broadcast %546 : vector<1x8xf32> to vector<4x8xf32>
    %548 = arith.mulf %547, %28 : vector<4x8xf32>
    %549 = arith.addf %545, %548 : vector<4x8xf32>
    %550 = vector.extract_strided_slice %538 {offsets = [3, 0], sizes = [1, 8], strides = [1, 1]} : vector<8x8xf32> to vector<1x8xf32>
    %551 = vector.broadcast %550 : vector<1x8xf32> to vector<4x8xf32>
    %552 = arith.mulf %551, %29 : vector<4x8xf32>
    %553 = arith.addf %549, %552 : vector<4x8xf32>
    %554 = vector.extract_strided_slice %538 {offsets = [4, 0], sizes = [1, 8], strides = [1, 1]} : vector<8x8xf32> to vector<1x8xf32>
    %555 = vector.broadcast %554 : vector<1x8xf32> to vector<4x8xf32>
    %556 = arith.mulf %555, %30 : vector<4x8xf32>
    %557 = arith.addf %553, %556 : vector<4x8xf32>
    %558 = vector.extract_strided_slice %538 {offsets = [5, 0], sizes = [1, 8], strides = [1, 1]} : vector<8x8xf32> to vector<1x8xf32>
    %559 = vector.broadcast %558 : vector<1x8xf32> to vector<4x8xf32>
    %560 = arith.mulf %559, %31 : vector<4x8xf32>
    %561 = arith.addf %557, %560 : vector<4x8xf32>
    %562 = vector.extract_strided_slice %538 {offsets = [6, 0], sizes = [1, 8], strides = [1, 1]} : vector<8x8xf32> to vector<1x8xf32>
    %563 = vector.broadcast %562 : vector<1x8xf32> to vector<4x8xf32>
    %564 = arith.mulf %563, %32 : vector<4x8xf32>
    %565 = arith.addf %561, %564 : vector<4x8xf32>
    %566 = vector.extract_strided_slice %538 {offsets = [7, 0], sizes = [1, 8], strides = [1, 1]} : vector<8x8xf32> to vector<1x8xf32>
    %567 = vector.broadcast %566 : vector<1x8xf32> to vector<4x8xf32>
    %568 = arith.mulf %567, %33 : vector<4x8xf32>
    %569 = arith.addf %565, %568 : vector<4x8xf32>
    %570 = tpu.concatenate %69, %136, %203, %270, %337, %404, %471, %538, %100, %167, %234, %301, %368, %435, %502, %569 in 0 : vector<8x8xf32>, vector<8x8xf32>, vector<8x8xf32>, vector<8x8xf32>, vector<8x8xf32>, vector<8x8xf32>, vector<8x8xf32>, vector<8x8xf32>, vector<4x8xf32>, vector<4x8xf32>, vector<4x8xf32>, vector<4x8xf32>, vector<4x8xf32>, vector<4x8xf32>, vector<4x8xf32>, vector<4x8xf32> -> vector<96x8xf32>
    %c0_86 = arith.constant 0 : index
    %c0_87 = arith.constant 0 : index
    %571 = vector.load %arg4[%c0_86, %c0_87] : memref<8x8xf32, #tpu.memory_space<vmem>>, vector<8x8xf32>
    %cst_88 = arith.constant dense<0.000000e+00> : vector<8x96xf32>
    %572 = tpu.matmul %571, %570, %cst_88 {dimension_numbers = #tpu.dot_dimension_numbers<[1], [1], [0], [0], [0, 0, 1, 0], [], []>} : vector<8x8xf32>, vector<96x8xf32>, vector<8x96xf32> -> vector<8x96xf32>
    %573 = vector.extract_strided_slice %572 {offsets = [0, 0], sizes = [8, 64], strides = [1, 1]} : vector<8x96xf32> to vector<8x64xf32>
    %c0_89 = arith.constant 0 : index
    %c0_90 = arith.constant 0 : index
    %c0_91 = arith.constant 0 : index
    %574 = vector.load %arg5[%c0_89, %c0_90, %c0_91] : memref<1x8x64xf32, #tpu.memory_space<vmem>>, vector<1x8x64xf32>
    %575 = vector.shape_cast %574 : vector<1x8x64xf32> to vector<8x64xf32>
    %576 = vector.shape_cast %573 : vector<8x64xf32> to vector<1x8x64xf32>
    tpu.vector_store %arg5[%c0_89, %c0_90, %c0_91], %576 {strides = array<i32>} : memref<1x8x64xf32, #tpu.memory_space<vmem>>, vector<1x8x64xf32>,
    %577 = vector.extract_strided_slice %572 {offsets = [0, 64], sizes = [8, 4], strides = [1, 1]} : vector<8x96xf32> to vector<8x4xf32>
    %578 = arith.truncf %577 : vector<8x4xf32> to vector<8x4xbf16>
    %c0_92 = arith.constant 0 : index
    %c0_93 = arith.constant 0 : index
    %c0_94 = arith.constant 0 : index
    %579 = vector.load %arg6[%c0_92, %c0_93, %c0_94] : memref<8x8x4xbf16, #tpu.memory_space<vmem>>, vector<1x8x4xbf16>
    %580 = vector.shape_cast %579 : vector<1x8x4xbf16> to vector<8x4xbf16>
    %581 = vector.shape_cast %578 : vector<8x4xbf16> to vector<1x8x4xbf16>
    tpu.vector_store %arg6[%c0_92, %c0_93, %c0_94], %581 {strides = array<i32>} : memref<8x8x4xbf16, #tpu.memory_space<vmem>>, vector<1x8x4xbf16>,
    %582 = vector.extract_strided_slice %572 {offsets = [0, 68], sizes = [8, 4], strides = [1, 1]} : vector<8x96xf32> to vector<8x4xf32>
    %583 = arith.truncf %582 : vector<8x4xf32> to vector<8x4xbf16>
    %c1 = arith.constant 1 : index
    %c0_95 = arith.constant 0 : index
    %c0_96 = arith.constant 0 : index
    %584 = vector.load %arg6[%c1, %c0_95, %c0_96] : memref<8x8x4xbf16, #tpu.memory_space<vmem>>, vector<1x8x4xbf16>
    %585 = vector.shape_cast %584 : vector<1x8x4xbf16> to vector<8x4xbf16>
    %586 = vector.shape_cast %583 : vector<8x4xbf16> to vector<1x8x4xbf16>
    tpu.vector_store %arg6[%c1, %c0_95, %c0_96], %586 {strides = array<i32>} : memref<8x8x4xbf16, #tpu.memory_space<vmem>>, vector<1x8x4xbf16>,
    %587 = vector.extract_strided_slice %572 {offsets = [0, 72], sizes = [8, 4], strides = [1, 1]} : vector<8x96xf32> to vector<8x4xf32>
    %588 = arith.truncf %587 : vector<8x4xf32> to vector<8x4xbf16>
    %c2 = arith.constant 2 : index
    %c0_97 = arith.constant 0 : index
    %c0_98 = arith.constant 0 : index
    %589 = vector.load %arg6[%c2, %c0_97, %c0_98] : memref<8x8x4xbf16, #tpu.memory_space<vmem>>, vector<1x8x4xbf16>
    %590 = vector.shape_cast %589 : vector<1x8x4xbf16> to vector<8x4xbf16>
    %591 = vector.shape_cast %588 : vector<8x4xbf16> to vector<1x8x4xbf16>
    tpu.vector_store %arg6[%c2, %c0_97, %c0_98], %591 {strides = array<i32>} : memref<8x8x4xbf16, #tpu.memory_space<vmem>>, vector<1x8x4xbf16>,
    %592 = vector.extract_strided_slice %572 {offsets = [0, 76], sizes = [8, 4], strides = [1, 1]} : vector<8x96xf32> to vector<8x4xf32>
    %593 = arith.truncf %592 : vector<8x4xf32> to vector<8x4xbf16>
    %c3 = arith.constant 3 : index
    %c0_99 = arith.constant 0 : index
    %c0_100 = arith.constant 0 : index
    %594 = vector.load %arg6[%c3, %c0_99, %c0_100] : memref<8x8x4xbf16, #tpu.memory_space<vmem>>, vector<1x8x4xbf16>
    %595 = vector.shape_cast %594 : vector<1x8x4xbf16> to vector<8x4xbf16>
    %596 = vector.shape_cast %593 : vector<8x4xbf16> to vector<1x8x4xbf16>
    tpu.vector_store %arg6[%c3, %c0_99, %c0_100], %596 {strides = array<i32>} : memref<8x8x4xbf16, #tpu.memory_space<vmem>>, vector<1x8x4xbf16>,
    %597 = vector.extract_strided_slice %572 {offsets = [0, 80], sizes = [8, 4], strides = [1, 1]} : vector<8x96xf32> to vector<8x4xf32>
    %598 = arith.truncf %597 : vector<8x4xf32> to vector<8x4xbf16>
    %c4 = arith.constant 4 : index
    %c0_101 = arith.constant 0 : index
    %c0_102 = arith.constant 0 : index
    %599 = vector.load %arg6[%c4, %c0_101, %c0_102] : memref<8x8x4xbf16, #tpu.memory_space<vmem>>, vector<1x8x4xbf16>
    %600 = vector.shape_cast %599 : vector<1x8x4xbf16> to vector<8x4xbf16>
    %601 = vector.shape_cast %598 : vector<8x4xbf16> to vector<1x8x4xbf16>
    tpu.vector_store %arg6[%c4, %c0_101, %c0_102], %601 {strides = array<i32>} : memref<8x8x4xbf16, #tpu.memory_space<vmem>>, vector<1x8x4xbf16>,
    %602 = vector.extract_strided_slice %572 {offsets = [0, 84], sizes = [8, 4], strides = [1, 1]} : vector<8x96xf32> to vector<8x4xf32>
    %603 = arith.truncf %602 : vector<8x4xf32> to vector<8x4xbf16>
    %c5 = arith.constant 5 : index
    %c0_103 = arith.constant 0 : index
    %c0_104 = arith.constant 0 : index
    %604 = vector.load %arg6[%c5, %c0_103, %c0_104] : memref<8x8x4xbf16, #tpu.memory_space<vmem>>, vector<1x8x4xbf16>
    %605 = vector.shape_cast %604 : vector<1x8x4xbf16> to vector<8x4xbf16>
    %606 = vector.shape_cast %603 : vector<8x4xbf16> to vector<1x8x4xbf16>
    tpu.vector_store %arg6[%c5, %c0_103, %c0_104], %606 {strides = array<i32>} : memref<8x8x4xbf16, #tpu.memory_space<vmem>>, vector<1x8x4xbf16>,
    %607 = vector.extract_strided_slice %572 {offsets = [0, 88], sizes = [8, 4], strides = [1, 1]} : vector<8x96xf32> to vector<8x4xf32>
    %608 = arith.truncf %607 : vector<8x4xf32> to vector<8x4xbf16>
    %c6 = arith.constant 6 : index
    %c0_105 = arith.constant 0 : index
    %c0_106 = arith.constant 0 : index
    %609 = vector.load %arg6[%c6, %c0_105, %c0_106] : memref<8x8x4xbf16, #tpu.memory_space<vmem>>, vector<1x8x4xbf16>
    %610 = vector.shape_cast %609 : vector<1x8x4xbf16> to vector<8x4xbf16>
    %611 = vector.shape_cast %608 : vector<8x4xbf16> to vector<1x8x4xbf16>
    tpu.vector_store %arg6[%c6, %c0_105, %c0_106], %611 {strides = array<i32>} : memref<8x8x4xbf16, #tpu.memory_space<vmem>>, vector<1x8x4xbf16>,
    %612 = vector.extract_strided_slice %572 {offsets = [0, 92], sizes = [8, 4], strides = [1, 1]} : vector<8x96xf32> to vector<8x4xf32>
    %613 = arith.truncf %612 : vector<8x4xf32> to vector<8x4xbf16>
    %c7 = arith.constant 7 : index
    %c0_107 = arith.constant 0 : index
    %c0_108 = arith.constant 0 : index
    %614 = vector.load %arg6[%c7, %c0_107, %c0_108] : memref<8x8x4xbf16, #tpu.memory_space<vmem>>, vector<1x8x4xbf16>
    %615 = vector.shape_cast %614 : vector<1x8x4xbf16> to vector<8x4xbf16>
    %616 = vector.shape_cast %613 : vector<8x4xbf16> to vector<1x8x4xbf16>
    tpu.vector_store %arg6[%c7, %c0_107, %c0_108], %616 {strides = array<i32>} : memref<8x8x4xbf16, #tpu.memory_space<vmem>>, vector<1x8x4xbf16>,
    return
  }
  func.func @transform_0(%arg0: i32, %arg1: i32) -> (i32, i32, i32) {
    %c0_i32 = arith.constant 0 : i32
    %c0_i32_0 = arith.constant 0 : i32
    return %arg0, %arg1, %c0_i32 : i32, i32, i32
  }
  func.func @transform_1(%arg0: i32, %arg1: i32) -> (i32, i32) {
    %c0_i32 = arith.constant 0 : i32
    %c0_i32_0 = arith.constant 0 : i32
    %c0_i32_1 = arith.constant 0 : i32
    return %c0_i32, %c0_i32_0 : i32, i32
  }
  func.func @transform_2(%arg0: i32, %arg1: i32) -> (i32, i32) {
    %c0_i32 = arith.constant 0 : i32
    %c0_i32_0 = arith.constant 0 : i32
    %c0_i32_1 = arith.constant 0 : i32
    return %c0_i32, %c0_i32_0 : i32, i32
  }
  func.func @transform_3(%arg0: i32, %arg1: i32) -> (i32, i32, i32) {
    %c0_i32 = arith.constant 0 : i32
    %c0_i32_0 = arith.constant 0 : i32
    return %arg0, %arg1, %c0_i32 : i32, i32, i32
  }
  func.func @transform_4(%arg0: i32, %arg1: i32) -> (i32, i32, i32) {
    %c0_i32 = arith.constant 0 : i32
    %c0_i32_0 = arith.constant 0 : i32
    return %arg0, %arg1, %c0_i32 : i32, i32, i32
  }
}

</mosaic_0001>

<bundles_post_ra>
// kernel: tpu_custom_call.1
= control target key start
LH: loop header
LB: loop body
LE: loop exit
PB: predicated region body
PF: predicated region fallthrough
CT: control target
= control target key end

     0   :  { %10 = vsyncpa [#allocation3], 0  ;;  %s3205_s0 = inlined_call_operand.vmem [shape: f32[2,8,32], index: 0, kind: input, shape index: {}]   ;;  %s3206_s1 = inlined_call_operand.vmem [shape: bf16[96,32], index: 1, kind: input, shape index: {}]   ;;  %s3207_s2 = inlined_call_operand.vmem [shape: f32[8,8], index: 2, kind: input, shape index: {}]   ;;  %s3208_s3 = inlined_call_operand.hbm [shape: f32[2,8,64], index: 3, kind: output, shape index: {0}]   ;;  %s3209_s4 = inlined_call_operand.vmem [shape: bf16[16,8,4], index: 4, kind: output, shape index: {1}]  }
   0x1   :  { %12 = vsyncpa [#allocation3 + $0x1], 0  ;;  %s2330_s15 = smov 0   ;;  %s2332_s16 = smov 0  }
   0x2   :  { %s2334_s17 = smov 0   ;;  %s2336_s18 = smov 0  }
   0x3   :  { %s2338_s19 = smov 0   ;;  %s2340_s20 = smov 0  }
   0x4 LB: > { %s1976_s21 = sadd.s32 4294967295, %s2291_s20   ;;  %s1977_s22 = sadd.s32 4294967294, %s2291_s20   ;;  %s2291_s20 = sphi %s2340_s20, %s18_s20   ;;  %s2287_s19 = sphi %s2338_s19, %s3254_s19   ;;  %s2283_s18 = sphi %s2336_s18, %s3253_s18   ;;  %s2279_s17 = sphi %s2334_s17, %s3252_s17   ;;  %s2275_s16 = sphi %s2332_s16, %s3251_s16   ;;  %s2271_s15 = sphi %s2330_s15, %s3250_s15  }
   0x5   : > { %s30_s23 = sadd.s32 1, %s2287_s19  ;;  %s109_s24 = sadd.s32 1, %s2279_s17 }
   0x6   : > { %p32_p0 = scmp.ge.s32.totalorder %s30_s23, 2  ;;  %p119_p1 = scmp.ne.s32.totalorder %s2279_s17, %s2275_s16 }
   0x7   : > { %p120_p2 = scmp.eq.s32.totalorder %s1976_s21, 1  ;;  %p125_p3 = scmp.ne.s32.totalorder %s2275_s16, %s2271_s15 }
   0x8   : > { %s3256_s23 = smov (%p32_p0, %s30_s23), 0  ;;  %p126_p5 = scmp.eq.s32.totalorder %s1977_s22, 1 }
   0x9   : > { %p2370_p4 = por %p120_p2, %p119_p1  ;;  %s104_s26 = ssub.s32 %s2287_s19, %s3256_s23 }
   0xa   : > { %p1980_p6 = scmp.ge.s32.totalorder %s2291_s20, 1  ;;  %p107_p7 = scmp.eq.s32.totalorder %s104_s26, 0 }
   0xb   : > { %p2377_p8 = por %p126_p5, %p125_p3  ;;  %p188_p9 = scmp.lt.s32.totalorder %s2291_s20, 3 }
   0xc   : > { %s2383_s28 = scalar_select %p107_p7, %s2279_s17, %s109_s24  }
   0xd   : > { %p189_p10 = pnand %p1980_p6, %p188_p9 }
   0xf   : > { %192 = sbr.rel (%p189_p10) target bundleno = 874 (0x36a), region = 32 }
  0x16   : > { %p224_p11 = scmp.lt.s32.totalorder %s2283_s18, 1  ;;  %v2175_v0 = vld [vmem:[%s3206_s1] sm:$0xff]   ;;  %vm294_vm0 = vcmask 261120   ;;  %v2176_v4 = vld [vmem:[%s3206_s1 + $0x8] sm:$0xff]   ;;  %v2177_v5 = vld [vmem:[%s3206_s1 + $0x10] sm:$0xff]   ;;  %vm398_vm1 = vcmask 60416  }
  0x17   : > { %2045 = vmatprep.mubr.msk.bf16.mxu0 %vm294_vm0, %v2175_v0  ;;  %v2178_v6 = vld [vmem:[%s3206_s1 + $0x18] sm:$0xff]   ;;  %v2179_v7 = vld [vmem:[%s3206_s1 + $0x20] sm:$0xff]   ;;  %v2180_v8 = vld [vmem:[%s3206_s1 + $0x28] sm:$0xff]   ;;  %vm474_vm2 = vcmask 1040384   ;;  %vm476_vm3 = vcmask 1041408   ;;  %vm478_vm4 = vcmask 1042432  }
  0x18   : > { %s225_s5 = scalar_select %p224_p11, %s2283_s18, 1  ;;  %vm480_vm5 = vcmask 1043456   ;;  %vm482_vm6 = vcmask 1044480   ;;  %vm484_vm7 = vcmask 1045504   ;;  %vm486_vm8 = vcmask 1046528  }
  0x19   : > { %vm488_vm9 = vcmask 64512   ;;  %vm2294_vm10 = vmmov 0   ;;  %vm1800_vm12 = vcmask 523264   ;;  %s2296_s10 = smov 56   ;;  %s2297_s11 = smov 64  }
  0x1a   : > { %s1982_s6 = sshll.u32 %s225_s5, 3  ;;  %vm2889_vm11 = vmpackc.low %vm488_vm9, %vm488_vm9  ;;  %s2298_s26 = smov [#allocation2]  }
  0x1b   : > { %s230_s9 = scalar_lea.vmem %s3205_s0, %s1982_s6  ;;  %s211_s6 = sand.u32 1, %s2275_s16  }
  0x1c   : > { %v247_v1 = vld [vmem:[%s230_s9] sm:$0xff]  ;;  %s1981_s7 = sshll.u32 %s211_s6, 3  ;;  %s2019_s9 = sshll.u32 %s2283_s18, 7 }
  0x1d   : > { %v251_v2 = vpack.c.bf16 %v247_v1, %v247_v1  ;;  %s213_s8 = scalar_lea.vmem [#allocation2], %s1981_s7  ;;  %s3152_s14 = scalar_lea.hbm %s3208_s3, %s2019_s9 }
  0x1e   : > { %s1869_s21 = sshll.u32 %s213_s8, 4  ;;  %s1847_s22 = scalar_lea.sflag [#allocation3], %s211_s6  ;;  %s1870_s21 = int_to_ptr.vmem [resolvable:$true] %s1869_s21 }
  0x1f   : > { %2108 = vmatprep.subr.msk.bf16.mxu0 %vm294_vm0, %v251_v2  ;;  %v314_v3 = vsel %vm294_vm0, %v251_v2, 0  ;;  %s2213_s24 = scalar_lea.vmem %s1870_s21, 128  ;;  %s2217_s29 = sshll.u32 %s2298_s26, 4  ;;  %s2218_s29 = int_to_ptr.vmem [resolvable:$false] %s2217_s29 }
  0x20   : > { %2044 = vmatpush3.bf16.xpose.msra.mxu0 %v314_v3  ;;  %p2214_p12 = scmp.ne.s32.totalorder %s1870_s21, %s2213_s24  ;;  %s2219_s30 = scalar_lea.vmem %s2218_s29, 256 }
  0x21   : > { %p2220_p1 = scmp.lt.s32.totalorder %s1870_s21, %s2218_s29  ;;  %p2221_p2 = scmp.lt.s32.totalorder %s2219_s30, %s2213_s24 }
  0x22   : > { %p2215_p13 = pnand %p2214_p12, %p2370_p4 }
  0x23   : > { %p2222_p3 = por %p2221_p2, %p2220_p1 }
  0x24   : > { %p2216_p0 = pneg %p2215_p13 }
  0x26   : > { %p2223_p5 = pnand %p2222_p3, %p2216_p0 }
  0x27   : > { %2046 = vmatmul.mubr.msk.bf16.vlgmr.msra.gmra.mrb[0].mxu0 %vm294_vm0, %v2176_v4 }
  0x28   : > { %2049 = vmatprep.mubr.msk.bf16.mxu0 %vm294_vm0, %v2177_v5 }
  0x2f   : > { %2050 = vmatmul.mubr.msk.bf16.gmra.mrb[4].mxu0 %vm294_vm0, %v2178_v6 }
  0x30   : > { %2053 = vmatprep.mubr.msk.bf16.mxu0 %vm294_vm0, %v2179_v7 }
  0x37   : > { %2054 = vmatmul.mubr.msk.bf16.gmra.mrb[8].mxu0 %vm294_vm0, %v2180_v8 }
  0xfa   : > { %v2416_v9 = vpop.f32.mrb[0].mxu0 }
  0xfb   : > { %v2418_v10 = vpop.f32.mrb[1].mxu0 }
  0xfc   : > { %v2420_v11 = vpop.f32.mrb[2].mxu0 }
  0xfd   : > { %v2422_v12 = vpop.f32.mrb[3].mxu0 }
 0x102   : > { %v2051_v13 = vpop.f32.mrb[4].mxu0 }
 0x103   : > { %v436_v14 = vmul.f32 %v2051_v13, %v2418_v10  ;;  %v2425_v15 = vrot.slane %v2051_v13, 4  ;;  %v764_v16 = vmul.f32 %v2051_v13, %v2422_v12  ;;  %v2429_v17 = vmul.f32 %v2051_v13, %v2416_v9  ;;  %v2431_v18 = vpop.f32.mrb[5].mxu0 }
 0x104   : > { %v2434_v19 = vmul.f32 %v2051_v13, %v2420_v11  ;;  %v2438_v20 = vmul.f32 %v2431_v18, %v2418_v10  ;;  %v2442_v21 = vmul.f32 %v2431_v18, %v2422_v12  ;;  %v2444_v22 = vpop.f32.mrb[6].mxu0 }
 0x105   : > { %v437_v23 = vsel %vm398_vm1, %v436_v14, 0.0  ;;  %v447_v24 = vmul.f32 %v2425_v15, %v2418_v10  ;;  %v618_v25 = vrot.slane %v436_v14, 4  ;;  %v765_v26 = vsel %vm398_vm1, %v764_v16, 0.0  ;;  %v2450_v27 = vpop.f32.mrb[7].mxu0 }
 0x106   : > { %v438_v28 = vrot.slane %v437_v23, 4  ;;  %v766_v29 = vrot.slane %v765_v26, 4  ;;  %v772_v30 = vmul.f32 %v2425_v15, %v2422_v12  ;;  %v932_v31 = vrot.slane %v764_v16, 4 }
 0x107   : > { %v448_v32 = vsel %vm398_vm1, %v447_v24, 0.0  ;;  %v608_v33 = vrot.slane %v447_v24, 4  ;;  %v620_v34 = vsel %vm398_vm1, %v618_v25, 0.0  ;;  %v1079_v35 = vsel %vm398_vm1, %v2429_v17, 0.0 }
 0x108   : > { %v439_v36 = vadd.f32 %v438_v28, %v437_v23  ;;  %v449_v37 = vrot.slane %v448_v32, 4  ;;  %v621_v38 = vrot.slane %v620_v34, 4  ;;  %v767_v39 = vadd.f32 %v766_v29, %v765_v26 }
 0x109   : > { %v610_v40 = vsel %vm398_vm1, %v608_v33, 0.0  ;;  %v773_v41 = vsel %vm398_vm1, %v772_v30, 0.0  ;;  %v922_v42 = vrot.slane %v772_v30, 4  ;;  %v934_v43 = vsel %vm398_vm1, %v932_v31, 0.0 }
 0x10a   : > { %v440_v44 = vrot.slane %v439_v36, 2  ;;  %v450_v45 = vadd.f32 %v449_v37, %v448_v32  ;;  %v611_v46 = vrot.slane %v610_v40, 4  ;;  %v622_v47 = vadd.f32 %v621_v38, %v620_v34 }
 0x10b   : > { %v768_v48 = vrot.slane %v767_v39, 2  ;;  %v774_v49 = vrot.slane %v773_v41, 4  ;;  %v924_v50 = vsel %vm398_vm1, %v922_v42, 0.0  ;;  %v935_v51 = vrot.slane %v934_v43, 4 }
 0x10c   : > { %v441_v52 = vadd.f32 %v440_v44, %v439_v36  ;;  %v451_v53 = vrot.slane %v450_v45, 2  ;;  %v612_v54 = vadd.f32 %v611_v46, %v610_v40  ;;  %v623_v55 = vrot.slane %v622_v47, 2 }
 0x10d   : > { %v769_v56 = vadd.f32 %v768_v48, %v767_v39  ;;  %v775_v57 = vadd.f32 %v774_v49, %v773_v41  ;;  %v925_v58 = vrot.slane %v924_v50, 4  ;;  %v936_v59 = vadd.f32 %v935_v51, %v934_v43 }
 0x10e   : > { %v442_v60 = vrot.slane %v441_v52, 1  ;;  %v452_v61 = vadd.f32 %v451_v53, %v450_v45  ;;  %v613_v62 = vrot.slane %v612_v54, 2  ;;  %v624_v63 = vadd.f32 %v623_v55, %v622_v47 }
 0x10f   : > { %v770_v0 = vrot.slane %v769_v56, 1  ;;  %v776_v1 = vrot.slane %v775_v57, 2  ;;  %v926_v2 = vadd.f32 %v925_v58, %v924_v50  ;;  %v937_v3 = vrot.slane %v936_v59, 2 }
 0x110   : > { %v453_v4 = vrot.slane %v452_v61, 1  ;;  %v614_v5 = vadd.f32 %v613_v62, %v612_v54  ;;  %v625_v6 = vrot.slane %v624_v63, 1  ;;  %v2463_v14 = vrot.slane %v2431_v18, 4 }
 0x111   : > { %v777_v7 = vadd.f32 %v776_v1, %v775_v57  ;;  %v927_v8 = vrot.slane %v926_v2, 2  ;;  %v938_v13 = vadd.f32 %v937_v3, %v936_v59  ;;  %v2465_v16 = vadd.f32 %v442_v60, %v441_v52 }
 0x112   : > { %v615_v23 = vrot.slane %v614_v5, 1  ;;  %v2467_v24 = vadd.f32 %v770_v0, %v769_v56  ;;  %v1080_v25 = vrot.slane %v1079_v35, 4  ;;  %v2469_v26 = vadd.f32 %v453_v4, %v452_v61 }
 0x113   : > { %v778_v28 = vrot.slane %v777_v7, 1  ;;  %v928_v29 = vadd.f32 %v927_v8, %v926_v2  ;;  %v1086_v30 = vmul.f32 %v2416_v9, %v2425_v15  ;;  %v2473_v31 = vadd.f32 %v625_v6, %v624_v63 }
 0x114   : > { %v1081_v32 = vadd.f32 %v1080_v25, %v1079_v35  ;;  %v1246_v33 = vrot.slane %v2429_v17, 4  ;;  %v1393_v34 = vsel %vm398_vm1, %v2434_v19, 0.0  ;;  %v2478_v36 = vadd.f32 %v615_v23, %v614_v5 }
 0x115   : > { %v2480_v37 = vadd.f32 %v778_v28, %v777_v7  ;;  %v939_v38 = vrot.slane %v938_v13, 1  ;;  %v1087_v39 = vsel %vm398_vm1, %v1086_v30, 0.0  ;;  %v1236_v42 = vrot.slane %v1086_v30, 4 }
 0x116   : > { %v1082_v40 = vrot.slane %v1081_v32, 2  ;;  %v1088_v41 = vrot.slane %v1087_v39, 4  ;;  %v1248_v43 = vsel %vm398_vm1, %v1246_v33, 0.0  ;;  %v929_v44 = vrot.slane %v928_v29, 1 }
 0x117   : > { %v1249_v45 = vrot.slane %v1248_v43, 4  ;;  %v1394_v35 = vrot.slane %v1393_v34, 4  ;;  %v1400_v17 = vmul.f32 %v2420_v11, %v2425_v15  ;;  %v1238_v48 = vsel %vm398_vm1, %v1236_v42, 0.0 }
 0x118   : > { %v1083_v46 = vadd.f32 %v1082_v40, %v1081_v32  ;;  %v1089_v47 = vadd.f32 %v1088_v41, %v1087_v39  ;;  %v1560_v49 = vrot.slane %v2434_v19, 4  ;;  %v1239_v50 = vrot.slane %v1238_v48, 4 }
 0x119   : > { %v1250_v51 = vadd.f32 %v1249_v45, %v1248_v43  ;;  %v1395_v52 = vadd.f32 %v1394_v35, %v1393_v34  ;;  %v1401_v53 = vsel %vm398_vm1, %v1400_v17, 0.0  ;;  %v2489_v54 = vadd.f32 %v939_v38, %v938_v13 }
 0x11a   : > { %v1090_v55 = vrot.slane %v1089_v47, 2  ;;  %v1402_v56 = vrot.slane %v1401_v53, 4  ;;  %v1550_v57 = vrot.slane %v1400_v17, 4  ;;  %v1240_v58 = vadd.f32 %v1239_v50, %v1238_v48 }
 0x11b   : > { %v1251_v59 = vrot.slane %v1250_v51, 2  ;;  %v1396_v60 = vrot.slane %v1395_v52, 2  ;;  %v1562_v15 = vsel %vm398_vm1, %v1560_v49, 0.0  ;;  %v1084_v61 = vrot.slane %v1083_v46, 1 }
 0x11c   : > { %v1091_v62 = vadd.f32 %v1090_v55, %v1089_v47  ;;  %v1403_v63 = vadd.f32 %v1402_v56, %v1401_v53  ;;  %v1552_v19 = vsel %vm398_vm1, %v1550_v57, 0.0  ;;  %v1241_v0 = vrot.slane %v1240_v58, 2 }
 0x11d   : > { %v1252_v1 = vadd.f32 %v1251_v59, %v1250_v51  ;;  %v1397_v2 = vadd.f32 %v1396_v60, %v1395_v52  ;;  %v1553_v3 = vrot.slane %v1552_v19, 4  ;;  %v1563_v6 = vrot.slane %v1562_v15, 4 }
 0x11e   : > { %v1092_v4 = vrot.slane %v1091_v62, 1  ;;  %v1404_v5 = vrot.slane %v1403_v63, 2  ;;  %v399_v7 = vsel %vm398_vm1, %v2438_v20, 0.0  ;;  %v2495_v8 = vadd.f32 %v929_v44, %v928_v29 }
 0x11f   : > { %v1242_v13 = vadd.f32 %v1241_v0, %v1240_v58  ;;  %v1253_v23 = vrot.slane %v1252_v1, 1  ;;  %v1554_v25 = vadd.f32 %v1553_v3, %v1552_v19  ;;  %v1398_v28 = vrot.slane %v1397_v2, 1 }
 0x120   : > { %v1405_v30 = vadd.f32 %v1404_v5, %v1403_v63  ;;  %v1564_v32 = vadd.f32 %v1563_v6, %v1562_v15  ;;  %v400_v33 = vrot.slane %v399_v7, 4  ;;  %v2497_v34 = vadd.f32 %v1084_v61, %v1083_v46 }
 0x121   : > { %v2499_v38 = vadd.f32 %v1092_v4, %v1091_v62  ;;  %v1243_v39 = vrot.slane %v1242_v13, 1  ;;  %v1555_v40 = vrot.slane %v1554_v25, 2  ;;  %v409_v29 = vmul.f32 %v2463_v14, %v2418_v10 }
 0x122   : > { %v1406_v41 = vrot.slane %v1405_v30, 1  ;;  %v1565_v42 = vrot.slane %v1564_v32, 2  ;;  %v401_v43 = vadd.f32 %v400_v33, %v399_v7  ;;  %v2503_v44 = vadd.f32 %v1253_v23, %v1252_v1 }
 0x123   : > { %v2505_v45 = vadd.f32 %v1555_v40, %v1554_v25  ;;  %v578_v35 = vrot.slane %v2438_v20, 4  ;;  %v733_v17 = vsel %vm398_vm1, %v2442_v21, 0.0  ;;  %v2510_v46 = vadd.f32 %v1398_v28, %v1397_v2 }
 0x124   : > { %v2512_v47 = vadd.f32 %v1565_v42, %v1564_v32  ;;  %v402_v48 = vrot.slane %v401_v43, 2  ;;  %v410_v49 = vsel %vm398_vm1, %v409_v29, 0.0  ;;  %v2515_v50 = vadd.f32 %v1243_v39, %v1242_v13 }
 0x125   : > { %3220 = vst [vmem:[#allocation5_spill] sm:$0xff] %v2510_v46  ;;  %v411_v51 = vrot.slane %v410_v49, 4  ;;  %v568_v52 = vrot.slane %v409_v29, 4  ;;  %v580_v53 = vsel %vm398_vm1, %v578_v35, 0.0  ;;  %v2518_v55 = vadd.f32 %v1406_v41, %v1405_v30 }
 0x126   : > { %v403_v56 = vadd.f32 %v402_v48, %v401_v43  ;;  %v581_v20 = vrot.slane %v580_v53, 4  ;;  %v734_v57 = vrot.slane %v733_v17, 4  ;;  %v1557_v58 = vrot.slane %v2505_v45, 1 }
 0x127   : > { %3221 = vst [vmem:[#allocation6_spill] sm:$0xff] %v2518_v55  ;;  %v412_v59 = vadd.f32 %v411_v51, %v410_v49  ;;  %v570_v60 = vsel %vm398_vm1, %v568_v52, 0.0  ;;  %v740_v15 = vmul.f32 %v2463_v14, %v2422_v12  ;;  %v1567_v61 = vrot.slane %v2512_v47, 1 }
 0x128   : > { %v404_v62 = vrot.slane %v403_v56, 1  ;;  %v571_v63 = vrot.slane %v570_v60, 4  ;;  %v582_v19 = vadd.f32 %v581_v20, %v580_v53  ;;  %v735_v1 = vadd.f32 %v734_v57, %v733_v17 }
 0x129   : > { %v413_v0 = vrot.slane %v412_v59, 2  ;;  %v741_v2 = vsel %vm398_vm1, %v740_v15, 0.0  ;;  %v882_v3 = vrot.slane %v740_v15, 4  ;;  %v892_v28 = vrot.slane %v2442_v21, 4 }
 0x12a   : > { %v405_v4 = vadd.f32 %v404_v62, %v403_v56  ;;  %v572_v5 = vadd.f32 %v571_v63, %v570_v60  ;;  %v583_v6 = vrot.slane %v582_v19, 2  ;;  %v742_v7 = vrot.slane %v741_v2, 4 }
 0x12b   : > { %v414_v13 = vadd.f32 %v413_v0, %v412_v59  ;;  %v736_v23 = vrot.slane %v735_v1, 2  ;;  %v884_v25 = vsel %vm398_vm1, %v882_v3, 0.0  ;;  %v894_v42 = vsel %vm398_vm1, %v892_v28, 0.0 }
 0x12c   : > { %v573_v30 = vrot.slane %v572_v5, 2  ;;  %v584_v32 = vadd.f32 %v583_v6, %v582_v19  ;;  %v743_v33 = vadd.f32 %v742_v7, %v741_v2  ;;  %v885_v39 = vrot.slane %v884_v25, 4 }
 0x12d   : > { %v415_v40 = vrot.slane %v414_v13, 1  ;;  %v737_v41 = vadd.f32 %v736_v23, %v735_v1  ;;  %v1046_v43 = vmul.f32 %v2416_v9, %v2431_v18  ;;  %v895_v52 = vrot.slane %v894_v42, 4 }
 0x12e   : > { %v574_v29 = vadd.f32 %v573_v30, %v572_v5  ;;  %v585_v35 = vrot.slane %v584_v32, 1  ;;  %v744_v17 = vrot.slane %v743_v33, 2  ;;  %v886_v48 = vadd.f32 %v885_v39, %v884_v25 }
 0x12f   : > { %v416_v49 = vadd.f32 %v415_v40, %v414_v13  ;;  %v738_v51 = vrot.slane %v737_v41, 1  ;;  %v1047_v21 = vsel %vm398_vm1, %v1046_v43, 0.0  ;;  %v896_v15 = vadd.f32 %v895_v52, %v894_v42 }
 0x130   : > { %v575_v53 = vrot.slane %v574_v29, 1  ;;  %v586_v56 = vadd.f32 %v585_v35, %v584_v32  ;;  %v745_v20 = vadd.f32 %v744_v17, %v743_v33  ;;  %v887_v57 = vrot.slane %v886_v48, 2 }
 0x131   : > { %v2533_v59 = vsel %vm474_vm2, %v405_v4, %v416_v49  ;;  %v739_v60 = vadd.f32 %v738_v51, %v737_v41  ;;  %v1048_v62 = vrot.slane %v1047_v21, 4  ;;  %v1054_v1 = vmul.f32 %v2416_v9, %v2463_v14 }
 0x132   : > { %v576_v63 = vadd.f32 %v575_v53, %v574_v29  ;;  %v746_v19 = vrot.slane %v745_v20, 1  ;;  %v888_v0 = vadd.f32 %v887_v57, %v886_v48  ;;  %v897_v2 = vrot.slane %v896_v15, 2 }
 0x133   : > { %v1049_v3 = vadd.f32 %v1048_v62, %v1047_v21  ;;  %v1206_v5 = vrot.slane %v1046_v43, 4  ;;  %v1360_v6 = vmul.f32 %v2420_v11, %v2431_v18  ;;  %v1055_v23 = vsel %vm398_vm1, %v1054_v1, 0.0 }
 0x134   : > { %v2540_v7 = vsel %vm474_vm2, %v576_v63, %v586_v56  ;;  %v747_v4 = vadd.f32 %v746_v19, %v745_v20  ;;  %v889_v13 = vrot.slane %v888_v0, 1  ;;  %v898_v25 = vadd.f32 %v897_v2, %v896_v15 }
 0x135   : > { %v1050_v28 = vrot.slane %v1049_v3, 2  ;;  %v1056_v30 = vrot.slane %v1055_v23, 4  ;;  %v1196_v32 = vrot.slane %v1054_v1, 4  ;;  %v1208_v40 = vsel %vm398_vm1, %v1206_v5, 0.0 }
 0x136   : > { %v2544_v33 = vsel %vm474_vm2, %v739_v60, %v747_v4  ;;  %v890_v39 = vadd.f32 %v889_v13, %v888_v0  ;;  %v1361_v41 = vsel %vm398_vm1, %v1360_v6, 0.0  ;;  %v899_v18 = vrot.slane %v898_v25, 1 }
 0x137   : > { %v1051_v42 = vadd.f32 %v1050_v28, %v1049_v3  ;;  %v1057_v43 = vadd.f32 %v1056_v30, %v1055_v23  ;;  %v1198_v29 = vsel %vm398_vm1, %v1196_v32, 0.0  ;;  %v1209_v17 = vrot.slane %v1208_v40, 4 }
 0x138   : > { %v1199_v35 = vrot.slane %v1198_v29, 4  ;;  %v1362_v48 = vrot.slane %v1361_v41, 4  ;;  %v1368_v49 = vmul.f32 %v2420_v11, %v2463_v14  ;;  %v900_v51 = vadd.f32 %v899_v18, %v898_v25 }
 0x139   : > { %v1052_v52 = vrot.slane %v1051_v42, 1  ;;  %v1058_v21 = vrot.slane %v1057_v43, 2  ;;  %v1520_v53 = vrot.slane %v1360_v6, 4  ;;  %v1210_v20 = vadd.f32 %v1209_v17, %v1208_v40 }
 0x13a   : > { %v1200_v56 = vadd.f32 %v1199_v35, %v1198_v29  ;;  %v1363_v57 = vadd.f32 %v1362_v48, %v1361_v41  ;;  %v1369_v60 = vsel %vm398_vm1, %v1368_v49, 0.0  ;;  %v2553_v15 = vsel %vm474_vm2, %v890_v39, %v900_v51 }
 0x13b   : > { %v1053_v62 = vadd.f32 %v1052_v52, %v1051_v42  ;;  %v1059_v63 = vadd.f32 %v1058_v21, %v1057_v43  ;;  %v1370_v19 = vrot.slane %v1369_v60, 4  ;;  %v1211_v1 = vrot.slane %v1210_v20, 2 }
 0x13c   : > { %v1201_v0 = vrot.slane %v1200_v56, 2  ;;  %v1364_v2 = vrot.slane %v1363_v57, 2  ;;  %v1510_v3 = vrot.slane %v1368_v49, 4  ;;  %v1522_v4 = vsel %vm398_vm1, %v1520_v53, 0.0 }
 0x13d   : > { %v1060_v14 = vrot.slane %v1059_v63, 1  ;;  %v1371_v5 = vadd.f32 %v1370_v19, %v1369_v60  ;;  %v455_v6 = vmul.f32 %v2444_v22, %v2418_v10  ;;  %v1212_v23 = vadd.f32 %v1211_v1, %v1210_v20 }
 0x13e   : > { %v1202_v13 = vadd.f32 %v1201_v0, %v1200_v56  ;;  %v1365_v25 = vadd.f32 %v1364_v2, %v1363_v57  ;;  %v1512_v28 = vsel %vm398_vm1, %v1510_v3, 0.0  ;;  %v1523_v40 = vrot.slane %v1522_v4, 4 }
 0x13f   : > { %v1061_v30 = vadd.f32 %v1060_v14, %v1059_v63  ;;  %v1372_v32 = vrot.slane %v1371_v5, 2  ;;  %v1513_v39 = vrot.slane %v1512_v28, 4  ;;  %v1213_v18 = vrot.slane %v1212_v23, 1 }
 0x140   : > { %v1203_v41 = vrot.slane %v1202_v13, 1  ;;  %v1366_v42 = vrot.slane %v1365_v25, 1  ;;  %v456_v43 = vsel %vm398_vm1, %v455_v6, 0.0  ;;  %v1524_v48 = vadd.f32 %v1523_v40, %v1522_v4 }
 0x141   : > { %v2561_v29 = vsel %vm474_vm2, %v1053_v62, %v1061_v30  ;;  %v1373_v35 = vadd.f32 %v1372_v32, %v1371_v5  ;;  %v1514_v17 = vadd.f32 %v1513_v39, %v1512_v28  ;;  %v1214_v51 = vadd.f32 %v1213_v18, %v1212_v23 }
 0x142   : > { %v1204_v49 = vadd.f32 %v1203_v41, %v1202_v13  ;;  %v1367_v52 = vadd.f32 %v1366_v42, %v1365_v25  ;;  %v457_v21 = vrot.slane %v456_v43, 4  ;;  %v1525_v20 = vrot.slane %v1524_v48, 2 }
 0x143   : > { %v1374_v53 = vrot.slane %v1373_v35, 1  ;;  %v1515_v56 = vrot.slane %v1514_v17, 2  ;;  %v2564_v57 = vrot.slane %v2444_v22, 4  ;;  %v638_v19 = vrot.slane %v455_v6, 4 }
 0x144   : > { %v2567_v60 = vsel %vm474_vm2, %v1204_v49, %v1214_v51  ;;  %v458_v63 = vadd.f32 %v457_v21, %v456_v43  ;;  %v780_v62 = vmul.f32 %v2444_v22, %v2422_v12  ;;  %v1526_v2 = vadd.f32 %v1525_v20, %v1524_v48 }
 0x145   : > { %v1375_v0 = vadd.f32 %v1374_v53, %v1373_v35  ;;  %v1516_v1 = vadd.f32 %v1515_v56, %v1514_v17  ;;  %v466_v3 = vmul.f32 %v2564_v57, %v2418_v10  ;;  %v640_v5 = vsel %vm398_vm1, %v638_v19, 0.0 }
 0x146   : > { %v459_v14 = vrot.slane %v458_v63, 2  ;;  %v781_v4 = vsel %vm398_vm1, %v780_v62, 0.0  ;;  %v788_v13 = vmul.f32 %v2564_v57, %v2422_v12  ;;  %v1527_v25 = vrot.slane %v1526_v2, 1 }
 0x147   : > { %v2578_v23 = vsel %vm474_vm2, %v1367_v52, %v1375_v0  ;;  %v1517_v6 = vrot.slane %v1516_v1, 1  ;;  %v467_v28 = vsel %vm398_vm1, %v466_v3, 0.0  ;;  %v628_v39 = vrot.slane %v466_v3, 4 }
 0x148   : > { %v460_v30 = vadd.f32 %v459_v14, %v458_v63  ;;  %v468_v32 = vrot.slane %v467_v28, 4  ;;  %v641_v40 = vrot.slane %v640_v5, 4  ;;  %v1528_v18 = vadd.f32 %v1527_v25, %v1526_v2 }
 0x149   : > { %v1518_v41 = vadd.f32 %v1517_v6, %v1516_v1  ;;  %v782_v42 = vrot.slane %v781_v4, 4  ;;  %v789_v43 = vsel %vm398_vm1, %v788_v13, 0.0  ;;  %v2585_v35 = vadd.f32 %v1557_v58, %v2505_v45 }
 0x14a   : > { %v469_v17 = vadd.f32 %v468_v32, %v467_v28  ;;  %v630_v48 = vsel %vm398_vm1, %v628_v39, 0.0  ;;  %v642_v49 = vadd.f32 %v641_v40, %v640_v5  ;;  %v790_v53 = vrot.slane %v789_v43, 4 }
 0x14b   : > { %3222 = vst [vmem:[#allocation7_spill] sm:$0xff] %v2585_v35  ;;  %v2589_v51 = vsel %vm474_vm2, %v1518_v41, %v1528_v18  ;;  %v631_v52 = vrot.slane %v630_v48, 4  ;;  %v783_v21 = vadd.f32 %v782_v42, %v781_v4  ;;  %v461_v56 = vrot.slane %v460_v30, 1 }
 0x14c   : > { %3223 = vst [vmem:[#allocation8_spill] sm:$0xff] %v2589_v51  ;;  %v470_v20 = vrot.slane %v469_v17, 2  ;;  %v643_v63 = vrot.slane %v642_v49, 2  ;;  %v942_v19 = vrot.slane %v788_v13, 4  ;;  %v791_v2 = vadd.f32 %v790_v53, %v789_v43 }
 0x14d   : > { %v632_v0 = vadd.f32 %v631_v52, %v630_v48  ;;  %v784_v1 = vrot.slane %v783_v21, 2  ;;  %v952_v3 = vrot.slane %v780_v62, 4  ;;  %v1094_v5 = vmul.f32 %v2444_v22, %v2416_v9 }
 0x14e   : > { %v471_v45 = vadd.f32 %v470_v20, %v469_v17  ;;  %v644_v58 = vadd.f32 %v643_v63, %v642_v49  ;;  %v944_v14 = vsel %vm398_vm1, %v942_v19, 0.0  ;;  %v792_v28 = vrot.slane %v791_v2, 2 }
 0x14f   : > { %v633_v6 = vrot.slane %v632_v0, 2  ;;  %v785_v25 = vadd.f32 %v784_v1, %v783_v21  ;;  %v945_v4 = vrot.slane %v944_v14, 4  ;;  %v954_v40 = vsel %vm398_vm1, %v952_v3, 0.0 }
 0x150   : > { %v472_v32 = vrot.slane %v471_v45, 1  ;;  %v645_v39 = vrot.slane %v644_v58, 1  ;;  %v1095_v13 = vsel %vm398_vm1, %v1094_v5, 0.0  ;;  %v793_v62 = vadd.f32 %v792_v28, %v791_v2 }
 0x151   : > { %v634_v41 = vadd.f32 %v633_v6, %v632_v0  ;;  %v786_v18 = vrot.slane %v785_v25, 1  ;;  %v946_v42 = vadd.f32 %v945_v4, %v944_v14  ;;  %v2599_v43 = vadd.f32 %v1567_v61, %v2512_v47 }
 0x152   : > { %v2601_v17 = vadd.f32 %v461_v56, %v460_v30  ;;  %v955_v48 = vrot.slane %v954_v40, 4  ;;  %v1096_v49 = vrot.slane %v1095_v13, 4  ;;  %v2603_v52 = vadd.f32 %v472_v32, %v471_v45 }
 0x153   : > { %3224 = vst [vmem:[#allocation9_spill] sm:$0xff] %v2599_v43  ;;  %v635_v21 = vrot.slane %v634_v41, 1  ;;  %v2605_v53 = vadd.f32 %v645_v39, %v644_v58  ;;  %v947_v20 = vrot.slane %v946_v42, 2  ;;  %v1102_v0 = vmul.f32 %v2416_v9, %v2564_v57 }
 0x154   : > { %v956_v63 = vadd.f32 %v955_v48, %v954_v40  ;;  %v1097_v19 = vadd.f32 %v1096_v49, %v1095_v13  ;;  %v1266_v1 = vrot.slane %v1094_v5, 4  ;;  %v2609_v2 = vadd.f32 %v786_v18, %v785_v25 }
 0x155   : > { %v794_v47 = vrot.slane %v793_v62, 1  ;;  %v948_v61 = vadd.f32 %v947_v20, %v946_v42  ;;  %v1408_v30 = vmul.f32 %v2444_v22, %v2420_v11  ;;  %v1103_v45 = vsel %vm398_vm1, %v1102_v0, 0.0 }
 0x156   : > { %v957_v56 = vrot.slane %v956_v63, 2  ;;  %v1098_v3 = vrot.slane %v1097_v19, 2  ;;  %v1256_v58 = vrot.slane %v1102_v0, 4  ;;  %v1104_v6 = vrot.slane %v1103_v45, 4 }
 0x157   : > { %v949_v14 = vrot.slane %v948_v61, 1  ;;  %v1268_v28 = vsel %vm398_vm1, %v1266_v1, 0.0  ;;  %v1409_v4 = vsel %vm398_vm1, %v1408_v30, 0.0  ;;  %v2617_v40 = vadd.f32 %v635_v21, %v634_v41 }
 0x158   : > { %v958_v32 = vadd.f32 %v957_v56, %v956_v63  ;;  %v1099_v5 = vadd.f32 %v1098_v3, %v1097_v19  ;;  %v1258_v25 = vsel %vm398_vm1, %v1256_v58, 0.0  ;;  %v1269_v39 = vrot.slane %v1268_v28, 4 }
 0x159   : > { %v1105_v13 = vadd.f32 %v1104_v6, %v1103_v45  ;;  %v1259_v22 = vrot.slane %v1258_v25, 4  ;;  %v1410_v18 = vrot.slane %v1409_v4, 4  ;;  %v2619_v42 = vadd.f32 %v794_v47, %v793_v62 }
 0x15a   : > { %v2621_v48 = vadd.f32 %v949_v14, %v948_v61  ;;  %v1270_v49 = vadd.f32 %v1269_v39, %v1268_v28  ;;  %v1416_v20 = vmul.f32 %v2420_v11, %v2564_v57  ;;  %v1580_v19 = vrot.slane %v1408_v30, 4 }
 0x15b   : > { %v1106_v0 = vrot.slane %v1105_v13, 2  ;;  %v1260_v1 = vadd.f32 %v1259_v22, %v1258_v25  ;;  %v1411_v63 = vadd.f32 %v1410_v18, %v1409_v4  ;;  %v959_v56 = vrot.slane %v958_v32, 1 }
 0x15c   : > { %v1100_v3 = vrot.slane %v1099_v5, 1  ;;  %v1271_v58 = vrot.slane %v1270_v49, 2  ;;  %v1417_v41 = vsel %vm398_vm1, %v1416_v20, 0.0  ;;  %v1570_v61 = vrot.slane %v1416_v20, 4 }
 0x15d   : > { %v1107_v21 = vadd.f32 %v1106_v0, %v1105_v13  ;;  %v1261_v45 = vrot.slane %v1260_v1, 2  ;;  %v1412_v6 = vrot.slane %v1411_v63, 2  ;;  %v1418_v62 = vrot.slane %v1417_v41, 4 }
 0x15e   : > { %v1272_v47 = vadd.f32 %v1271_v58, %v1270_v49  ;;  %v1582_v14 = vsel %vm398_vm1, %v1580_v19, 0.0  ;;  %v417_v57 = vmul.f32 %v2450_v27, %v2418_v10  ;;  %v1572_v22 = vsel %vm398_vm1, %v1570_v61, 0.0  ;;  %v2637_v19 = vpop.f32.mrb[8].mxu0 }
 0x15f   : > { %v1108_v28 = vrot.slane %v1107_v21, 1  ;;  %v1262_v25 = vadd.f32 %v1261_v45, %v1260_v1  ;;  %v1413_v4 = vadd.f32 %v1412_v6, %v1411_v63  ;;  %v1419_v30 = vadd.f32 %v1418_v62, %v1417_v41  ;;  %3225 = vst [vmem:[#allocation10_spill] sm:$0xff] %v2637_v19  ;;  %v2639_v41 = vpop.f32.mrb[9].mxu0 }
 0x160   : > { %v1273_v39 = vrot.slane %v1272_v47, 1  ;;  %v1583_v18 = vrot.slane %v1582_v14, 4  ;;  %v418_v13 = vsel %vm398_vm1, %v417_v57, 0.0  ;;  %v2631_v0 = vadd.f32 %v959_v56, %v958_v32  ;;  %3226 = vst [vmem:[#allocation11_spill] sm:$0xff] %v2639_v41 }
 0x161   : > { %v2633_v43 = vadd.f32 %v1100_v3, %v1099_v5  ;;  %v2635_v49 = vadd.f32 %v1108_v28, %v1107_v21  ;;  %v1420_v20 = vrot.slane %v1419_v30, 2  ;;  %v1263_v58 = vrot.slane %v1262_v25, 1  ;;  %v2646_v5 = vpop.f32.mrb[10].mxu0 }
 0x162   : > { %v1573_v35 = vrot.slane %v1572_v22, 4  ;;  %v1584_v1 = vadd.f32 %v1583_v18, %v1582_v14  ;;  %v419_v63 = vrot.slane %v418_v13, 4  ;;  %v2641_v45 = vadd.f32 %v1273_v39, %v1272_v47  ;;  %3227 = vst [vmem:[#allocation12_spill] sm:$0xff] %v2646_v5  ;;  %v2648_v28 = vpop.f32.mrb[11].mxu0 }
 0x163   : > { %v1414_v6 = vrot.slane %v1413_v4, 1  ;;  %v1421_v62 = vadd.f32 %v1420_v20, %v1419_v30  ;;  %v2644_v32 = vrot.slane %v2450_v27, 4  ;;  %v598_v61 = vrot.slane %v417_v57, 4  ;;  %3228 = vst [vmem:[#allocation13_spill] sm:$0xff] %v2648_v28 }
 0x164   : > { %v1574_v56 = vadd.f32 %v1573_v35, %v1572_v22  ;;  %v1585_v3 = vrot.slane %v1584_v1, 2  ;;  %v420_v21 = vadd.f32 %v419_v63, %v418_v13  ;;  %v748_v47 = vmul.f32 %v2450_v27, %v2422_v12 }
 0x165   : > { %v1422_v14 = vrot.slane %v1421_v62, 1  ;;  %v428_v18 = vmul.f32 %v2644_v32, %v2418_v10  ;;  %v756_v30 = vmul.f32 %v2644_v32, %v2422_v12  ;;  %v600_v35 = vsel %vm398_vm1, %v598_v61, 0.0 }
 0x166   : > { %v1575_v39 = vrot.slane %v1574_v56, 2  ;;  %v2656_v20 = vadd.f32 %v1585_v3, %v1584_v1  ;;  %v421_v5 = vrot.slane %v420_v21, 2  ;;  %v2659_v22 = vadd.f32 %v1263_v58, %v1262_v25 }
 0x167   : > { %v429_v57 = vsel %vm398_vm1, %v428_v18, 0.0  ;;  %v588_v13 = vrot.slane %v428_v18, 4  ;;  %v601_v63 = vrot.slane %v600_v35, 4  ;;  %v2662_v19 = vadd.f32 %v1414_v6, %v1413_v4 }
 0x168   : > { %3229 = vst [vmem:[#allocation14_spill] sm:$0xff] %v2656_v20  ;;  %v2664_v10 = vadd.f32 %v1575_v39, %v1574_v56  ;;  %v422_v28 = vadd.f32 %v421_v5, %v420_v21  ;;  %v430_v41 = vrot.slane %v429_v57, 4  ;;  %v749_v3 = vsel %vm398_vm1, %v748_v47, 0.0 }
 0x169   : > { %3230 = vst [vmem:[#allocation15_spill] sm:$0xff] %v2662_v19  ;;  %v590_v12 = vsel %vm398_vm1, %v588_v13, 0.0  ;;  %v602_v1 = vadd.f32 %v601_v63, %v600_v35  ;;  %v757_v61 = vsel %vm398_vm1, %v756_v30, 0.0  ;;  %v2669_v25 = vadd.f32 %v1422_v14, %v1421_v62 }
 0x16a   : > { %3231 = vst [vmem:[#allocation16_spill] sm:$0xff] %v2664_v10  ;;  %v423_v18 = vrot.slane %v422_v28, 1  ;;  %v431_v51 = vadd.f32 %v430_v41, %v429_v57  ;;  %v591_v4 = vrot.slane %v590_v12, 4  ;;  %v750_v5 = vrot.slane %v749_v3, 4 }
 0x16b   : > { %3232 = vst [vmem:[#allocation17_spill] sm:$0xff] %v2669_v25  ;;  %v603_v6 = vrot.slane %v602_v1, 2  ;;  %v758_v56 = vrot.slane %v757_v61, 4  ;;  %v902_v13 = vrot.slane %v756_v30, 4  ;;  %v912_v20 = vrot.slane %v748_v47, 4 }
 0x16c   : > { %v424_v39 = vadd.f32 %v423_v18, %v422_v28  ;;  %v432_v35 = vrot.slane %v431_v51, 2  ;;  %v592_v63 = vadd.f32 %v591_v4, %v590_v12  ;;  %v751_v14 = vadd.f32 %v750_v5, %v749_v3 }
 0x16d   : > { %v604_v62 = vadd.f32 %v603_v6, %v602_v1  ;;  %v759_v25 = vadd.f32 %v758_v56, %v757_v61  ;;  %v904_v57 = vsel %vm398_vm1, %v902_v13, 0.0  ;;  %v914_v30 = vsel %vm398_vm1, %v912_v20, 0.0 }
 0x16e   : > { %v433_v58 = vadd.f32 %v432_v35, %v431_v51  ;;  %v477_v41 = vsel %vm476_vm3, %v2533_v59, %v424_v39  ;;  %v593_v19 = vrot.slane %v592_v63, 2  ;;  %v752_v21 = vrot.slane %v751_v14, 2 }
 0x16f   : > { %v605_v55 = vrot.slane %v604_v62, 1  ;;  %v760_v28 = vrot.slane %v759_v25, 2  ;;  %v905_v10 = vrot.slane %v904_v57, 4  ;;  %v2679_v12 = vmul.f32 %v2416_v9, %v2450_v27 }
 0x170   : > { %v434_v18 = vrot.slane %v433_v58, 1  ;;  %v594_v51 = vadd.f32 %v593_v19, %v592_v63  ;;  %v753_v3 = vadd.f32 %v752_v21, %v751_v14  ;;  %v915_v6 = vrot.slane %v914_v30, 4 }
 0x171   : > { %v606_v1 = vadd.f32 %v605_v55, %v604_v62  ;;  %v761_v59 = vadd.f32 %v760_v28, %v759_v25  ;;  %v906_v4 = vadd.f32 %v905_v10, %v904_v57  ;;  %v1063_v47 = vsel %vm398_vm1, %v2679_v12, 0.0 }
 0x172   : > { %v435_v61 = vadd.f32 %v434_v18, %v433_v58  ;;  %v595_v5 = vrot.slane %v594_v51, 1  ;;  %v754_v56 = vrot.slane %v753_v3, 1  ;;  %v1064_v35 = vrot.slane %v1063_v47, 4 }
 0x173   : > { %v762_v39 = vrot.slane %v761_v59, 1  ;;  %v907_v13 = vrot.slane %v906_v4, 2  ;;  %v916_v46 = vadd.f32 %v915_v6, %v914_v30  ;;  %v1070_v19 = vmul.f32 %v2416_v9, %v2644_v32 }
 0x174   : > { %v479_v20 = vsel %vm478_vm4, %v477_v41, %v435_v61  ;;  %v596_v25 = vadd.f32 %v595_v5, %v594_v51  ;;  %v755_v10 = vadd.f32 %v754_v56, %v753_v3  ;;  %v1065_v14 = vadd.f32 %v1064_v35, %v1063_v47 }
 0x175   : > { %v481_v55 = vsel %vm480_vm5, %v479_v20, %v2465_v16  ;;  %v763_v58 = vadd.f32 %v762_v39, %v761_v59  ;;  %v908_v63 = vadd.f32 %v907_v13, %v906_v4  ;;  %v917_v62 = vrot.slane %v916_v46, 2 }
 0x176   : > { %v483_v21 = vsel %vm482_vm6, %v481_v55, %v2469_v26  ;;  %v648_v57 = vsel %vm476_vm3, %v2540_v7, %v596_v25  ;;  %v797_v9 = vsel %vm476_vm3, %v2544_v33, %v755_v10  ;;  %v1071_v16 = vsel %vm398_vm1, %v1070_v19, 0.0 }
 0x177   : > { %v485_v41 = vsel %vm484_vm7, %v483_v21, %v2601_v17  ;;  %v649_v26 = vsel %vm478_vm4, %v648_v57, %v606_v1  ;;  %v798_v18 = vsel %vm478_vm4, %v797_v9, %v763_v58  ;;  %v909_v30 = vrot.slane %v908_v63, 1 }
 0x178   : > { %v2699_v28 = vsel %vm486_vm8, %v485_v41, %v2603_v52  ;;  %v650_v7 = vsel %vm480_vm5, %v649_v26, %v2478_v36  ;;  %v799_v33 = vsel %vm480_vm5, %v798_v18, %v2467_v24  ;;  %v918_v51 = vadd.f32 %v917_v62, %v916_v46 }
 0x179   : > { %v489_v17 = vsel %vm488_vm9, %v2699_v28, -inf  ;;  %v651_v52 = vsel %vm482_vm6, %v650_v7, %v2473_v31  ;;  %v800_v1 = vsel %vm482_vm6, %v799_v33, %v2480_v37  ;;  %v910_v59 = vadd.f32 %v909_v30, %v908_v63 }
 0x17a   : > { %v490_v3 = vrot.slane %v489_v17, 4  ;;  %v652_v61 = vsel %vm484_vm7, %v651_v52, %v2617_v40  ;;  %v801_v4 = vsel %vm484_vm7, %v800_v1, %v2609_v2  ;;  %v919_v6 = vrot.slane %v918_v51, 1 }
 0x17b   : > { %v1066_v36 = vrot.slane %v1065_v14, 2  ;;  %v2719_v24 = vsel %vm486_vm8, %v652_v61, %v2605_v53  ;;  %v2723_v31 = vsel %vm486_vm8, %v801_v4, %v2619_v42  ;;  %v962_v37 = vsel %vm476_vm3, %v2553_v15, %v910_v59 }
 0x17c   : > { %v491_v47 = vmax.f32 %v489_v17, %v490_v3  ;;  %v654_v46 = vsel %vm488_vm9, %v2719_v24, -inf  ;;  %v803_v2 = vsel %vm488_vm9, %v2723_v31, -inf  ;;  %v920_v40 = vadd.f32 %v919_v6, %v918_v51 }
 0x17d   : > { %v1067_v5 = vadd.f32 %v1066_v36, %v1065_v14  ;;  %v655_v39 = vrot.slane %v654_v46, 4  ;;  %v804_v35 = vrot.slane %v803_v2, 4  ;;  %v1072_v53 = vrot.slane %v1071_v16, 4 }
 0x17e   : > { %v492_v56 = vrot.slane %v491_v47, 2  ;;  %v963_v20 = vsel %vm478_vm4, %v962_v37, %v920_v40  ;;  %v1216_v42 = vrot.slane %v1070_v19, 4  ;;  %v1226_v55 = vrot.slane %v2679_v12, 4 }
 0x17f   : > { %v1068_v13 = vrot.slane %v1067_v5, 1  ;;  %v656_v15 = vmax.f32 %v654_v46, %v655_v39  ;;  %v805_v10 = vmax.f32 %v803_v2, %v804_v35  ;;  %v964_v58 = vsel %vm480_vm5, %v963_v20, %v2495_v8 }
 0x180   : > { %v493_v25 = vmax.f32 %v491_v47, %v492_v56  ;;  %v965_v21 = vsel %vm482_vm6, %v964_v58, %v2489_v54  ;;  %v1073_v62 = vadd.f32 %v1072_v53, %v1071_v16  ;;  %v1218_v14 = vsel %vm398_vm1, %v1216_v42, 0.0 }
 0x181   : > { %v1069_v63 = vadd.f32 %v1068_v13, %v1067_v5  ;;  %v657_v57 = vrot.slane %v656_v15, 2  ;;  %v806_v9 = vrot.slane %v805_v10, 2  ;;  %v966_v19 = vsel %vm484_vm7, %v965_v21, %v2621_v48 }
 0x182   : > { %v494_v41 = vrot.slane %v493_v25, 1  ;;  %v2742_v12 = vsel %vm486_vm8, %v966_v19, %v2631_v0  ;;  %v1074_v26 = vrot.slane %v1073_v62, 2  ;;  %v1219_v18 = vrot.slane %v1218_v14, 4 }
 0x183   : > { %v1111_v8 = vsel %vm476_vm3, %v2561_v29, %v1069_v63  ;;  %v658_v30 = vmax.f32 %v656_v15, %v657_v57  ;;  %v807_v16 = vmax.f32 %v805_v10, %v806_v9  ;;  %v968_v17 = vsel %vm488_vm9, %v2742_v12, -inf }
 0x184   : > { %v495_v54 = vmax.f32 %v493_v25, %v494_v41  ;;  %v969_v7 = vrot.slane %v968_v17, 4  ;;  %v1075_v33 = vadd.f32 %v1074_v26, %v1073_v62  ;;  %v1220_v51 = vadd.f32 %v1219_v18, %v1218_v14 }
 0x185   : > { %v1228_v48 = vsel %vm398_vm1, %v1226_v55, 0.0  ;;  %v659_v0 = vrot.slane %v658_v30, 1  ;;  %v808_v52 = vrot.slane %v807_v16, 1  ;;  %v1376_v4 = vmul.f32 %v2420_v11, %v2450_v27 }
 0x186   : > { %v496_v3 = vsub.f32 %v2699_v28, %v495_v54  ;;  %v1229_v1 = vrot.slane %v1228_v48, 4  ;;  %v970_v59 = vmax.f32 %v968_v17, %v969_v7  ;;  %v1076_v61 = vrot.slane %v1075_v33, 1 }
 0x187   : > { %v1221_v29 = vrot.slane %v1220_v51, 2  ;;  %v660_v36 = vmax.f32 %v658_v30, %v659_v0  ;;  %v809_v47 = vmax.f32 %v807_v16, %v808_v52  ;;  %v1377_v5 = vsel %vm398_vm1, %v1376_v4, 0.0 }
 0x188   : > { %v497_v6 = vmul.f32 1.442695, %v496_v3  ;;  %v1230_v37 = vadd.f32 %v1229_v1, %v1228_v48  ;;  %v971_v46 = vrot.slane %v970_v59, 2  ;;  %v1077_v2 = vadd.f32 %v1076_v61, %v1075_v33 }
 0x189   : > { %v1222_v40 = vadd.f32 %v1221_v29, %v1220_v51  ;;  %v661_v28 = vsub.f32 %v2719_v24, %v660_v36  ;;  %v810_v56 = vsub.f32 %v2723_v31, %v809_v47  ;;  %v1378_v27 = vrot.slane %v1377_v5, 4 }
 0x18a   : > { %2181 = vpow2.f32 %v497_v6  ;;  %v1231_v39 = vrot.slane %v1230_v37, 2  ;;  %v972_v35 = vmax.f32 %v970_v59, %v971_v46  ;;  %v1112_v53 = vsel %vm478_vm4, %v1111_v8, %v1077_v2 }
 0x18b   : > { %v1223_v20 = vrot.slane %v1222_v40, 1  ;;  %v662_v13 = vmul.f32 1.442695, %v661_v28  ;;  %v811_v42 = vmul.f32 1.442695, %v810_v56  ;;  %v1113_v55 = vsel %vm480_vm5, %v1112_v53, %v2497_v34 }
 0x18c   : > { %v1232_v25 = vadd.f32 %v1231_v39, %v1230_v37  ;;  %v973_v15 = vrot.slane %v972_v35, 1  ;;  %v1114_v10 = vsel %vm482_vm6, %v1113_v55, %v2499_v38  ;;  %v1379_v24 = vadd.f32 %v1378_v27, %v1377_v5 }
 0x18d   : > { %v1224_v58 = vadd.f32 %v1223_v20, %v1222_v40  ;;  %2183 = vpow2.f32 %v662_v13  ;;  %v1115_v31 = vsel %vm484_vm7, %v1114_v10, %v2633_v43  ;;  %v1384_v63 = vmul.f32 %v2420_v11, %v2644_v32 }
 0x18e   : > { %v1233_v21 = vrot.slane %v1232_v25, 1  ;;  %2185 = vpow2.f32 %v811_v42  ;;  %v974_v62 = vmax.f32 %v972_v35, %v973_v15  ;;  %v2766_v34 = vsel %vm486_vm8, %v1115_v31, %v2635_v49 }
 0x18f   : > { %v1276_v14 = vsel %vm476_vm3, %v2567_v60, %v1224_v58  ;;  %v1117_v38 = vsel %vm488_vm9, %v2766_v34, -inf  ;;  %v1380_v57 = vrot.slane %v1379_v24, 2  ;;  %v1385_v43 = vsel %vm398_vm1, %v1384_v63, 0.0 }
 0x190   : > { %v1234_v41 = vadd.f32 %v1233_v21, %v1232_v25  ;;  %v975_v9 = vsub.f32 %v2742_v12, %v974_v62  ;;  %v1118_v19 = vrot.slane %v1117_v38, 4  ;;  %v1386_v11 = vrot.slane %v1385_v43, 4 }
 0x191   : > { %v1530_v32 = vrot.slane %v1384_v63, 4  ;;  %v1381_v8 = vadd.f32 %v1380_v57, %v1379_v24  ;;  %v1540_v49 = vrot.slane %v1376_v4, 4  ;;  %v2293_v16 = vmov 0.0|0.0  }
 0x192   : > { %v1277_v26 = vsel %vm478_vm4, %v1276_v14, %v1234_v41  ;;  %v976_v18 = vmul.f32 1.442695, %v975_v9  ;;  %v1119_v54 = vmax.f32 %v1117_v38, %v1118_v19  ;;  %v1387_v30 = vadd.f32 %v1386_v11, %v1385_v43  ;;  %2084 = vmatprep.subr.bf16.mxu1 %v2293_v16 }
 0x193   : > { %v1278_v60 = vsel %vm480_vm5, %v1277_v26, %v2515_v50  ;;  %v1382_v7 = vrot.slane %v1381_v8, 1  ;;  %v1532_v33 = vsel %vm398_vm1, %v1530_v32, 0.0  ;;  %v1542_v51 = vsel %vm398_vm1, %v1540_v49, 0.0 }
 0x194   : > { %v2778_v17 = vpop.eup %2181  ;;  %v1279_v12 = vsel %vm482_vm6, %v1278_v60, %v2503_v44  ;;  %2187 = vpow2.f32 %v976_v18  ;;  %v1120_v3 = vrot.slane %v1119_v54, 2  ;;  %v1388_v44 = vrot.slane %v1387_v30, 2  ;;  %v3234_v60 = vld [vmem:[#allocation6_spill] sm:$0xff] }
 0x195   : > { %v499_v48 = vsel %vm488_vm9, %v2778_v17, 0.0  ;;  %v1280_v50 = vsel %vm484_vm7, %v1279_v12, %v2659_v22  ;;  %v1383_v1 = vadd.f32 %v1382_v7, %v1381_v8  ;;  %v1533_v29 = vrot.slane %v1532_v33, 4  ;;  %v3233_v8 = vld [vmem:[#allocation5_spill] sm:$0xff] }
 0x196   : > { %v500_v0 = vrot.slane %v499_v48, 4  ;;  %v2790_v52 = vsel %vm486_vm8, %v1280_v50, %v2641_v45  ;;  %v1121_v59 = vmax.f32 %v1119_v54, %v1120_v3  ;;  %v1543_v4 = vrot.slane %v1542_v51, 4 }
 0x197   : > { %v1282_v61 = vsel %vm488_vm9, %v2790_v52, -inf  ;;  %v2794_v6 = vpop.eup %2183  ;;  %v1389_v37 = vadd.f32 %v1388_v44, %v1387_v30  ;;  %v1425_v22 = vsel %vm476_vm3, %v2578_v23, %v1383_v1  ;;  %v1534_v40 = vadd.f32 %v1533_v29, %v1532_v33  ;;  %v3235_v33 = vld [vmem:[#allocation15_spill] sm:$0xff] }
 0x198   : > { %v501_v36 = vadd.f32 %v500_v0, %v499_v48  ;;  %v1283_v47 = vrot.slane %v1282_v61, 4  ;;  %v2798_v46 = vpop.eup %2185  ;;  %v664_v45 = vsel %vm488_vm9, %v2794_v6, 0.0  ;;  %v1122_v2 = vrot.slane %v1121_v59, 1  ;;  %v3236_v0 = vld [vmem:[#allocation17_spill] sm:$0xff] }
 0x199   : > { %v1544_v5 = vadd.f32 %v1543_v4, %v1542_v51  ;;  %v665_v56 = vrot.slane %v664_v45, 4  ;;  %v813_v39 = vsel %vm488_vm9, %v2798_v46, 0.0  ;;  %v1390_v27 = vrot.slane %v1389_v37, 1  ;;  %v3237_v4 = vld [vmem:[#allocation8_spill] sm:$0xff] }
 0x19a   : > { %v502_v28 = vrot.slane %v501_v36, 2  ;;  %v1284_v35 = vmax.f32 %v1282_v61, %v1283_v47  ;;  %v814_v53 = vrot.slane %v813_v39, 4  ;;  %v1123_v20 = vmax.f32 %v1121_v59, %v1122_v2 }
 0x19b   : > { %v1535_v13 = vrot.slane %v1534_v40, 2  ;;  %v666_v23 = vadd.f32 %v665_v56, %v664_v45  ;;  %v1545_v25 = vrot.slane %v1544_v5, 2  ;;  %v1391_v58 = vadd.f32 %v1390_v27, %v1389_v37 }
 0x19c   : > { %v503_v42 = vadd.f32 %v502_v28, %v501_v36  ;;  %v1285_v55 = vrot.slane %v1284_v35, 2  ;;  %v815_v15 = vadd.f32 %v814_v53, %v813_v39  ;;  %v1124_v10 = vsub.f32 %v2766_v34, %v1123_v20 }
 0x19d   : > { %v1536_v24 = vadd.f32 %v1535_v13, %v1534_v40  ;;  %v667_v21 = vrot.slane %v666_v23, 2  ;;  %v1546_v62 = vadd.f32 %v1545_v25, %v1544_v5  ;;  %v1426_v57 = vsel %vm478_vm4, %v1425_v22, %v1391_v58  ;;  %v3238_v5 = vld [vmem:[#allocation16_spill] sm:$0xff]  ;;  %v3241_v13 = vld [vmem:[#allocation14_spill] sm:$0xff]  ;;  %v3243_v25 = vld [vmem:[#allocation9_spill] sm:$0xff] }
 0x19e   : > { %v504_v31 = vrot.slane %v503_v42, 1  ;;  %v1286_v63 = vmax.f32 %v1284_v35, %v1285_v55  ;;  %v2805_v14 = vpop.eup %2187  ;;  %v816_v38 = vrot.slane %v815_v15, 2  ;;  %v1125_v41 = vmul.f32 1.442695, %v1124_v10  ;;  %v3240_v35 = vld [vmem:[#allocation7_spill] sm:$0xff] }
 0x19f   : > { %v1537_v43 = vrot.slane %v1536_v24, 1  ;;  %v668_v19 = vadd.f32 %v667_v21, %v666_v23  ;;  %v978_v11 = vsel %vm488_vm9, %v2805_v14, 0.0  ;;  %v1427_v49 = vsel %vm480_vm5, %v1426_v57, %v3233_v8 }
 0x1a0   : > { %v505_v9 = vadd.f32 %v504_v31, %v503_v42  ;;  %v1287_v32 = vrot.slane %v1286_v63, 1  ;;  %v817_v34 = vadd.f32 %v816_v38, %v815_v15  ;;  %v979_v26 = vrot.slane %v978_v11, 4 }
 0x1a1   : > { %2189 = vpow2.f32 %v1125_v41  ;;  %v669_v18 = vrot.slane %v668_v19, 1  ;;  %v1428_v30 = vsel %vm482_vm6, %v1427_v49, %v3234_v60  ;;  %v1538_v48 = vadd.f32 %v1537_v43, %v1536_v24 }
 0x1a2   : > { %2191 = vrcp.f32 %v505_v9  ;;  %v1288_v54 = vmax.f32 %v1286_v63, %v1287_v32  ;;  %v818_v12 = vrot.slane %v817_v34, 1  ;;  %v980_v7 = vadd.f32 %v979_v26, %v978_v11 }
 0x1a3   : > { %v1429_v51 = vsel %vm484_vm7, %v1428_v30, %v3235_v33  ;;  %v670_v3 = vadd.f32 %v669_v18, %v668_v19  ;;  %v1547_v44 = vrot.slane %v1546_v62, 1  ;;  %v1590_v36 = vsel %vm476_vm3, %v3237_v4, %v1538_v48 }
 0x1a4   : > { %v1289_v50 = vsub.f32 %v2790_v52, %v1288_v54  ;;  %v2819_v1 = vsel %vm486_vm8, %v1429_v51, %v3236_v0  ;;  %v819_v59 = vadd.f32 %v818_v12, %v817_v34  ;;  %v981_v61 = vrot.slane %v980_v7, 2 }
 0x1a5   : > { %v1431_v29 = vsel %vm488_vm9, %v2819_v1, -inf  ;;  %2193 = vrcp.f32 %v670_v3  ;;  %v1548_v22 = vadd.f32 %v1547_v44, %v1546_v62  ;;  %v508_v52 = vlaneseq  ;;  %v3244_v3 = vld [vmem:[#allocation11_spill] sm:$0xff] }
 0x1a6   : > { %v1290_v47 = vmul.f32 1.442695, %v1289_v50  ;;  %v1432_v37 = vrot.slane %v1431_v29, 4  ;;  %2195 = vrcp.f32 %v819_v59  ;;  %v982_v45 = vadd.f32 %v981_v61, %v980_v7 }
 0x1a7   : > { %v1591_v40 = vsel %vm478_vm4, %v1590_v36, %v1548_v22  ;;  %v3239_v28 = vrot.slane %v3238_v5, 1  ;;  %v2831_v20 = vshrl.u32 %v508_v52, 7  ;;  %v2295_v27 = vmov 0.0  }
 0x1a8   : > { %2197 = vpow2.f32 %v1290_v47  ;;  %v1433_v2 = vmax.f32 %v1431_v29, %v1432_v37  ;;  %v983_v39 = vrot.slane %v982_v45, 1  ;;  %v1592_v53 = vsel %vm480_vm5, %v1591_v40, %v3240_v35  ;;  %2081 = vmatprep.mubr.msk.f32.mxu1 %vm2294_vm10, %v2295_v27 }
 0x1a9   : > { %v1578_v56 = vadd.f32 %v3239_v28, %v3238_v5  ;;  %v3242_v42 = vrot.slane %v3241_v13, 1  ;;  %v1593_v15 = vsel %vm482_vm6, %v1592_v53, %v3243_v25  ;;  %v2842_v31 = vsub.s32 0, %v2831_v20  ;;  %v3248_v28 = vld [vmem:[#allocation10_spill] sm:$0xff] }
 0x1aa   : > { %v1434_v55 = vrot.slane %v1433_v2, 2  ;;  %v984_v58 = vadd.f32 %v983_v39, %v982_v45  ;;  %v2845_v21 = vsub.s32 1, %v2831_v20  ;;  %v2853_v57 = vsub.s32 2, %v2831_v20 }
 0x1ab   : > { %v1588_v23 = vadd.f32 %v3242_v42, %v3241_v13  ;;  %v2838_v10 = vpop.eup %2189  ;;  %v1594_v24 = vsel %vm484_vm7, %v1593_v15, %v1578_v56  ;;  %v2861_v34 = vsub.s32 3, %v2831_v20  ;;  %v2864_v26 = vsub.s32 4, %v2831_v20 }
 0x1ac   : > { %v2192_v63 = vpop.eup %2191  ;;  %v1127_v62 = vsel %vm488_vm9, %v2838_v10, 0.0  ;;  %v1435_v38 = vmax.f32 %v1433_v2, %v1434_v55  ;;  %2199 = vrcp.f32 %v984_v58  ;;  %v2903_v39 = vsub.s32 5, %v2831_v20 }
 0x1ad   : > { %v2850_v41 = vsel %vm486_vm8, %v1594_v24, %v1588_v23  ;;  %v2856_v43 = vmul.f32 %v2192_v63, %v2778_v17  ;;  %v1128_v9 = vrot.slane %v1127_v62, 4  ;;  %v2909_v25 = vsub.s32 6, %v2831_v20 }
 0x1ae   : > { %v1596_v19 = vsel %vm488_vm9, %v2850_v41, -inf  ;;  %v1436_v11 = vrot.slane %v1435_v38, 1  ;;  %v2915_v63 = vsub.s32 7, %v2831_v20  ;;  %v3249_v20 = vld [vmem:[#allocation12_spill] sm:$0xff] }
 0x1af   : > { %v1597_v32 = vrot.slane %v1596_v19, 4  ;;  %v1129_v8 = vadd.f32 %v1128_v9, %v1127_v62  ;;  %v511_v49 = vrot.slane %v2856_v43, %v2842_v31  ;;  %v516_v17 = vrot.slane %v2856_v43, %v2845_v21  ;;  %v2194_v54 = vpop.eup %2193 }
 0x1b0   : > { %v525_v18 = vrot.slane %v2856_v43, %v2853_v57  ;;  %v1437_v60 = vmax.f32 %v1435_v38, %v1436_v11  ;;  %v531_v12 = vrot.slane %v2856_v43, %v2861_v34  ;;  %v540_v7 = vrot.slane %v2856_v43, %v2864_v26  ;;  %v2196_v33 = vpop.eup %2195 }
 0x1b1   : > { %v1598_v30 = vmax.f32 %v1596_v19, %v1597_v32  ;;  %v2877_v51 = vmul.f32 %v2194_v54, %v2794_v6  ;;  %v1130_v48 = vrot.slane %v1129_v8, 2  ;;  %v512_v50 = vmul.f32 %v511_v49, %v3244_v3  ;;  %v3247_v6 = vld [vmem:[#allocation13_spill] sm:$0xff] }
 0x1b2   : > { %v517_v0 = vmul.f32 %v516_v17, %v3244_v3  ;;  %v2881_v44 = vpop.eup %2197  ;;  %v2884_v59 = vmul.f32 %v2196_v33, %v2798_v46  ;;  %v1438_v61 = vsub.f32 %v2819_v1, %v1437_v60  ;;  %v526_v36 = vmul.f32 %v525_v18, %v3247_v6 }
 0x1b3   : > { %v1599_v29 = vrot.slane %v1598_v30, 2  ;;  %v1131_v47 = vadd.f32 %v1130_v48, %v1129_v8  ;;  %v1292_v37 = vsel %vm488_vm9, %v2881_v44, 0.0  ;;  %v2085_v22 = vpack.c.bf16 %v2877_v51, %v2856_v43 }
 0x1b4   : > { %v519_v46 = vrot.slane %v517_v0, 4  ;;  %v1293_v45 = vrot.slane %v1292_v37, 4  ;;  %v1439_v52 = vmul.f32 1.442695, %v1438_v61  ;;  %v532_v2 = vmul.f32 %v531_v12, %v3247_v6 }
 0x1b5   : > { %v1600_v1 = vmax.f32 %v1598_v30, %v1599_v29  ;;  %v1132_v40 = vrot.slane %v1131_v47, 1  ;;  %2087 = vmatpush3.bf16.xpose.msk.msra.mxu1 %vm2889_vm11, %v2085_v22  ;;  %v541_v56 = vmul.f32 %v3248_v28, %v540_v7  ;;  %v546_v55 = vrot.slane %v2856_v43, %v2903_v39 }
 0x1b6   : > { %v521_v5 = vadd.f32 %v519_v46, %v512_v50  ;;  %v1294_v35 = vadd.f32 %v1293_v45, %v1292_v37  ;;  %2201 = vpow2.f32 %v1439_v52  ;;  %2088 = vmatprep.subr.bf16.mxu1 %v2293_v16  ;;  %v534_v27 = vrot.slane %v532_v2, 4  ;;  %v2200_v13 = vpop.eup %2199 }
 0x1b7   : > { %v1601_v53 = vrot.slane %v1600_v1, 1  ;;  %v1133_v42 = vadd.f32 %v1132_v40, %v1131_v47  ;;  %v2912_v15 = vmul.f32 %v2200_v13, %v2805_v14  ;;  %v547_v38 = vmul.f32 %v3248_v28, %v546_v55 }
 0x1b8   : > { %v527_v23 = vadd.f32 %v526_v36, %v521_v5  ;;  %v1295_v58 = vrot.slane %v1294_v35, 2  ;;  %v555_v9 = vrot.slane %v2856_v43, %v2909_v25  ;;  %v561_v14 = vrot.slane %v2856_v43, %v2915_v63 }
 0x1b9   : > { %v1602_v24 = vmax.f32 %v1600_v1, %v1601_v53  ;;  %2203 = vrcp.f32 %v1133_v42  ;;  %v2089_v32 = vpack.c.bf16 %v2912_v15, %v2884_v59  ;;  %v549_v49 = vrot.slane %v547_v38, 4 }
 0x1ba   : > { %v536_v62 = vadd.f32 %v534_v27, %v527_v23  ;;  %v1296_v19 = vadd.f32 %v1295_v58, %v1294_v35  ;;  %v556_v17 = vmul.f32 %v3249_v20, %v555_v9  ;;  %v676_v18 = vrot.slane %v2877_v51, %v2842_v31 }
 0x1bb   : > { %v1603_v11 = vsub.f32 %v2850_v41, %v1602_v24  ;;  %v562_v30 = vmul.f32 %v3249_v20, %v561_v14  ;;  %v681_v41 = vrot.slane %v2877_v51, %v2845_v21  ;;  %v690_v7 = vrot.slane %v2877_v51, %v2853_v57 }
 0x1bc   : > { %v542_v8 = vadd.f32 %v541_v56, %v536_v62  ;;  %v1297_v54 = vrot.slane %v1296_v19, 1  ;;  %v677_v43 = vmul.f32 %v676_v18, %v3244_v3  ;;  %v696_v33 = vrot.slane %v2877_v51, %v2861_v34 }
 0x1bd   : > { %v1604_v60 = vmul.f32 1.442695, %v1603_v11  ;;  %2091 = vmatpush3.bf16.xpose.msk.msra.mxu1 %vm2889_vm11, %v2089_v32  ;;  %v564_v50 = vrot.slane %v562_v30, 4  ;;  %v682_v0 = vmul.f32 %v681_v41, %v3244_v3  ;;  %v691_v29 = vmul.f32 %v690_v7, %v3247_v6 }
 0x1be   : > { %v551_v12 = vadd.f32 %v549_v49, %v542_v8  ;;  %v1298_v48 = vadd.f32 %v1297_v54, %v1296_v19  ;;  %2092 = vmatprep.subr.bf16.mxu1 %v2293_v16  ;;  %v697_v36 = vmul.f32 %v696_v33, %v3247_v6  ;;  %v705_v47 = vrot.slane %v2877_v51, %v2864_v26 }
 0x1bf   : > { %2205 = vpow2.f32 %v1604_v60  ;;  %v684_v22 = vrot.slane %v682_v0, 4  ;;  %v711_v46 = vrot.slane %v2877_v51, %v2903_v39  ;;  %v720_v45 = vrot.slane %v2877_v51, %v2909_v25 }
 0x1c0   : > { %v557_v61 = vadd.f32 %v556_v17, %v551_v12  ;;  %v2944_v37 = vpop.eup %2201  ;;  %2207 = vrcp.f32 %v1298_v48  ;;  %v699_v2 = vrot.slane %v697_v36, 4  ;;  %v706_v40 = vmul.f32 %v3248_v28, %v705_v47 }
 0x1c1   : > { %v1441_v52 = vsel %vm488_vm9, %v2944_v37, 0.0  ;;  %v686_v56 = vadd.f32 %v684_v22, %v677_v43  ;;  %v712_v35 = vmul.f32 %v3248_v28, %v711_v46  ;;  %v721_v53 = vmul.f32 %v3249_v20, %v720_v45 }
 0x1c2   : > { %v2952_v1 = vadd.f32 %v564_v50, %v557_v61  ;;  %v1442_v5 = vrot.slane %v1441_v52, 4  ;;  %v726_v13 = vrot.slane %v2877_v51, %v2915_v63  ;;  %v825_v42 = vrot.slane %v2884_v59, %v2842_v31 }
 0x1c3   : > { %v2204_v27 = vpop.eup %2203  ;;  %v830_v23 = vrot.slane %v2884_v59, %v2845_v21  ;;  %v839_v55 = vrot.slane %v2884_v59, %v2853_v57  ;;  %v692_v62 = vadd.f32 %v691_v29, %v686_v56  ;;  %v714_v38 = vrot.slane %v712_v35, 4 }
 0x1c4   : > { %v2966_v58 = vmul.f32 %v2204_v27, %v2838_v10  ;;  %v1443_v24 = vadd.f32 %v1442_v5, %v1441_v52  ;;  %v727_v9 = vmul.f32 %v3249_v20, %v726_v13  ;;  %v826_v19 = vmul.f32 %v825_v42, %v3244_v3 }
 0x1c5   : > { %v831_v51 = vmul.f32 %v830_v23, %v3244_v3  ;;  %v840_v11 = vmul.f32 %v839_v55, %v3247_v6  ;;  %v701_v14 = vadd.f32 %v699_v2, %v692_v62  ;;  %v845_v8 = vrot.slane %v2884_v59, %v2861_v34 }
 0x1c6   : > { %v1444_v32 = vrot.slane %v1443_v24, 2  ;;  %v854_v10 = vrot.slane %v2884_v59, %v2864_v26  ;;  %v729_v49 = vrot.slane %v727_v9, 4  ;;  %v860_v18 = vrot.slane %v2884_v59, %v2903_v39 }
 0x1c7   : > { %v833_v17 = vrot.slane %v831_v51, 4  ;;  %v869_v54 = vrot.slane %v2884_v59, %v2909_v25  ;;  %v707_v41 = vadd.f32 %v706_v40, %v701_v14  ;;  %v846_v12 = vmul.f32 %v845_v8, %v3247_v6 }
 0x1c8   : > { %v1445_v30 = vadd.f32 %v1444_v32, %v1443_v24  ;;  %v855_v43 = vmul.f32 %v3248_v28, %v854_v10  ;;  %v861_v48 = vmul.f32 %v3248_v28, %v860_v18  ;;  %v875_v52 = vrot.slane %v2884_v59, %v2915_v63 }
 0x1c9   : > { %v2980_v60 = vpop.eup %2205  ;;  %v835_v33 = vadd.f32 %v833_v17, %v826_v19  ;;  %v870_v50 = vmul.f32 %v3249_v20, %v869_v54  ;;  %v716_v36 = vadd.f32 %v714_v38, %v707_v41  ;;  %v848_v47 = vrot.slane %v846_v12, 4 }
 0x1ca   : > { %v1606_v7 = vsel %vm488_vm9, %v2980_v60, 0.0  ;;  %v2208_v0 = vpop.eup %2207  ;;  %v1446_v61 = vrot.slane %v1445_v30, 1  ;;  %v863_v45 = vrot.slane %v861_v48, 4  ;;  %v990_v56 = vrot.slane %v2912_v15, %v2842_v31 }
 0x1cb   : > { %v1607_v29 = vrot.slane %v1606_v7, 4  ;;  %v2989_v22 = vmul.f32 %v2208_v0, %v2881_v44  ;;  %v841_v46 = vadd.f32 %v840_v11, %v835_v33  ;;  %v722_v5 = vadd.f32 %v721_v53, %v716_v36 }
 0x1cc   : > { %v1447_v2 = vadd.f32 %v1446_v61, %v1445_v30  ;;  %v876_v13 = vmul.f32 %v3249_v20, %v875_v52  ;;  %v995_v44 = vrot.slane %v2912_v15, %v2845_v21  ;;  %v991_v59 = vmul.f32 %v990_v56, %v3244_v3 }
 0x1cd   : > { %v1608_v40 = vadd.f32 %v1607_v29, %v1606_v7  ;;  %v2093_v35 = vpack.c.bf16 %v2989_v22, %v2966_v58  ;;  %v850_v27 = vadd.f32 %v848_v47, %v841_v46  ;;  %v731_v23 = vadd.f32 %v729_v49, %v722_v5 }
 0x1ce   : > { %2209 = vrcp.f32 %v1447_v2  ;;  %v878_v55 = vrot.slane %v876_v13, 4  ;;  %v996_v24 = vmul.f32 %v995_v44, %v3244_v3  ;;  %v1004_v62 = vrot.slane %v2912_v15, %v2853_v57 }
 0x1cf   : > { %v1609_v42 = vrot.slane %v1608_v40, 2  ;;  %2095 = vmatpush3.bf16.xpose.msk.msra.mxu1 %vm2889_vm11, %v2093_v35  ;;  %v856_v53 = vadd.f32 %v855_v43, %v850_v27  ;;  %v1010_v9 = vrot.slane %v2912_v15, %v2861_v34  ;;  %v1019_v19 = vrot.slane %v2912_v15, %v2864_v26 }
 0x1d0   : > { %2096 = vmatprep.subr.bf16.mxu1 %v2293_v16  ;;  %v1025_v51 = vrot.slane %v2912_v15, %v2903_v39  ;;  %v998_v32 = vrot.slane %v996_v24, 4  ;;  %v1005_v14 = vmul.f32 %v1004_v62, %v3247_v6  ;;  %v1034_v8 = vrot.slane %v2912_v15, %v2909_v25 }
 0x1d1   : > { %v1610_v38 = vadd.f32 %v1609_v42, %v1608_v40  ;;  %v865_v11 = vadd.f32 %v863_v45, %v856_v53  ;;  %v1011_v49 = vmul.f32 %v1010_v9, %v3247_v6  ;;  %v1020_v17 = vmul.f32 %v3248_v28, %v1019_v19 }
 0x1d2   : > { %v1026_v18 = vmul.f32 %v3248_v28, %v1025_v51  ;;  %v1000_v30 = vadd.f32 %v998_v32, %v991_v59  ;;  %v1035_v41 = vmul.f32 %v3249_v20, %v1034_v8  ;;  %v1040_v12 = vrot.slane %v2912_v15, %v2915_v63 }
 0x1d3   : > { %v1611_v10 = vrot.slane %v1610_v38, 1  ;;  %v871_v54 = vadd.f32 %v870_v50, %v865_v11  ;;  %v1013_v7 = vrot.slane %v1011_v49, 4  ;;  %v1675_v33 = vrot.slane %v731_v23, 4 }
 0x1d4   : > { %v1006_v0 = vadd.f32 %v1005_v14, %v1000_v30  ;;  %v1041_v61 = vmul.f32 %v3249_v20, %v1040_v12  ;;  %v1139_v29 = vrot.slane %v2966_v58, %v2842_v31  ;;  %v1144_v36 = vrot.slane %v2966_v58, %v2845_v21 }
 0x1d5   : > { %v1612_v43 = vadd.f32 %v1611_v10, %v1610_v38  ;;  %v880_v48 = vadd.f32 %v878_v55, %v871_v54  ;;  %v3027_v50 = vsel %vm480_vm5, %v2952_v1, %v1675_v33  ;;  %v1153_v15 = vrot.slane %v2966_v58, %v2853_v57 }
 0x1d6   : > { %v1015_v47 = vadd.f32 %v1013_v7, %v1006_v0  ;;  %v1028_v46 = vrot.slane %v1026_v18, 4  ;;  %v1140_v45 = vmul.f32 %v1139_v29, %v3244_v3  ;;  %v1159_v52 = vrot.slane %v2966_v58, %v2861_v34 }
 0x1d7   : > { %2211 = vrcp.f32 %v1612_v43  ;;  %v1145_v40 = vmul.f32 %v1144_v36, %v3244_v3  ;;  %v1154_v5 = vmul.f32 %v1153_v15, %v3247_v6  ;;  %v1168_v1 = vrot.slane %v2966_v58, %v2864_v26 }
 0x1d8   : > { %v2210_v2 = vpop.eup %2209  ;;  %v1174_v56 = vrot.slane %v2966_v58, %v2903_v39  ;;  %v1021_v35 = vadd.f32 %v1020_v17, %v1015_v47  ;;  %v1043_v27 = vrot.slane %v1041_v61, 4  ;;  %v1160_v13 = vmul.f32 %v1159_v52, %v3247_v6 }
 0x1d9   : > { %v1183_v44 = vrot.slane %v2966_v58, %v2909_v25  ;;  %v1147_v42 = vrot.slane %v1145_v40, 4  ;;  %v1169_v23 = vmul.f32 %v3248_v28, %v1168_v1  ;;  %v1189_v53 = vrot.slane %v2966_v58, %v2915_v63 }
 0x1da   : > { %v1175_v59 = vmul.f32 %v3248_v28, %v1174_v56  ;;  %v3050_v55 = vmul.f32 %v2210_v2, %v2944_v37  ;;  %v1030_v24 = vadd.f32 %v1028_v46, %v1021_v35  ;;  %v1304_v38 = vrot.slane %v2989_v22, %v2842_v31 }
 0x1db   : > { %v1184_v62 = vmul.f32 %v3249_v20, %v1183_v44  ;;  %v1149_v9 = vadd.f32 %v1147_v42, %v1140_v45  ;;  %v1162_v19 = vrot.slane %v1160_v13, 4  ;;  %v1190_v51 = vmul.f32 %v3249_v20, %v1189_v53 }
 0x1dc   : > { %v1309_v11 = vrot.slane %v2989_v22, %v2845_v21  ;;  %v1036_v32 = vadd.f32 %v1035_v41, %v1030_v24  ;;  %v1305_v14 = vmul.f32 %v1304_v38, %v3244_v3  ;;  %v1318_v37 = vrot.slane %v2989_v22, %v2853_v57 }
 0x1dd   : > { %v1324_v58 = vrot.slane %v2989_v22, %v2861_v34  ;;  %v1155_v8 = vadd.f32 %v1154_v5, %v1149_v9  ;;  %v1177_v10 = vrot.slane %v1175_v59, 4  ;;  %v1333_v17 = vrot.slane %v2989_v22, %v2864_v26 }
 0x1de   : > { %v1310_v49 = vmul.f32 %v1309_v11, %v3244_v3  ;;  %v1045_v18 = vadd.f32 %v1043_v27, %v1036_v32  ;;  %v1319_v54 = vmul.f32 %v1318_v37, %v3247_v6  ;;  %v1339_v41 = vrot.slane %v2989_v22, %v2903_v39 }
 0x1df   : > { %v1325_v30 = vmul.f32 %v1324_v58, %v3247_v6  ;;  %v1164_v43 = vadd.f32 %v1162_v19, %v1155_v8  ;;  %v1334_v33 = vmul.f32 %v3248_v28, %v1333_v17  ;;  %v1348_v0 = vrot.slane %v2989_v22, %v2909_v25 }
 0x1e0   : > { %v1312_v7 = vrot.slane %v1310_v49, 4  ;;  %v1678_v29 = vrot.slane %v1045_v18, 4  ;;  %v1192_v36 = vrot.slane %v1190_v51, 4  ;;  %v1340_v15 = vmul.f32 %v3248_v28, %v1339_v41 }
 0x1e1   : > { %v2212_v12 = vpop.eup %2211  ;;  %v1170_v47 = vadd.f32 %v1169_v23, %v1164_v43  ;;  %v1349_v45 = vmul.f32 %v3249_v20, %v1348_v0  ;;  %v1354_v52 = vrot.slane %v2989_v22, %v2915_v63  ;;  %v1327_v5 = vrot.slane %v1325_v30, 4 }
 0x1e2   : > { %v3074_v61 = vmul.f32 %v2212_v12, %v2980_v60  ;;  %v1314_v46 = vadd.f32 %v1312_v7, %v1305_v14  ;;  %v1687_v40 = vsel %vm480_vm5, %v880_v48, %v1678_v29  ;;  %v1453_v60 = vrot.slane %v3050_v55, %v2842_v31 }
 0x1e3   : > { %v2101_v1 = vpack.c.bf16 %v1687_v40, %v3027_v50  ;;  %v1179_v56 = vadd.f32 %v1177_v10, %v1170_v47  ;;  %v1355_v27 = vmul.f32 %v3249_v20, %v1354_v52  ;;  %v1458_v13 = vrot.slane %v3050_v55, %v2845_v21 }
 0x1e4   : > { %v2097_v2 = vpack.c.bf16 %v3074_v61, %v3050_v55  ;;  %v1320_v35 = vadd.f32 %v1319_v54, %v1314_v46  ;;  %v1454_v22 = vmul.f32 %v1453_v60, %v3244_v3  ;;  %v1467_v48 = vrot.slane %v3050_v55, %v2853_v57 }
 0x1e5   : > { %v1473_v44 = vrot.slane %v3050_v55, %v2861_v34  ;;  %v1185_v50 = vadd.f32 %v1184_v62, %v1179_v56  ;;  %v1342_v23 = vrot.slane %v1340_v15, 4  ;;  %v1482_v59 = vrot.slane %v3050_v55, %v2864_v26 }
 0x1e6   : > { %2099 = vmatpush3.bf16.xpose.msk.msra.mxu1 %vm2889_vm11, %v2097_v2  ;;  %v1329_v42 = vadd.f32 %v1327_v5, %v1320_v35  ;;  %v1459_v53 = vmul.f32 %v1458_v13, %v3244_v3  ;;  %v1468_v24 = vmul.f32 %v1467_v48, %v3247_v6  ;;  %v1488_v9 = vrot.slane %v3050_v55, %v2903_v39 }
 0x1e7   : > { %2100 = vmatprep.subr.bf16.mxu1 %v2293_v16  ;;  %v1474_v38 = vmul.f32 %v1473_v44, %v3247_v6  ;;  %v1194_v19 = vadd.f32 %v1192_v36, %v1185_v50  ;;  %v1483_v11 = vmul.f32 %v3248_v28, %v1482_v59  ;;  %v1497_v62 = vrot.slane %v3050_v55, %v2909_v25  ;;  %v1690_v50 = vld [vmem:[%s3207_s2] sm:$0xff] }
 0x1e8   : > { %v1335_v51 = vadd.f32 %v1334_v33, %v1329_v42  ;;  %v1461_v32 = vrot.slane %v1459_v53, 4  ;;  %v1489_v14 = vmul.f32 %v3248_v28, %v1488_v9  ;;  %v1503_v37 = vrot.slane %v3050_v55, %v2915_v63 }
 0x1e9   : > { %v1498_v8 = vmul.f32 %v3249_v20, %v1497_v62  ;;  %v1618_v10 = vrot.slane %v3074_v61, %v2842_v31  ;;  %v1623_v49 = vrot.slane %v3074_v61, %v2845_v21  ;;  %v1357_v17 = vrot.slane %v1355_v27, 4 }
 0x1ea   : > { %v1344_v58 = vadd.f32 %v1342_v23, %v1335_v51  ;;  %v1463_v18 = vadd.f32 %v1461_v32, %v1454_v22  ;;  %v1504_v54 = vmul.f32 %v3249_v20, %v1503_v37  ;;  %v1632_v30 = vrot.slane %v3074_v61, %v2853_v57 }
 0x1eb   : > { %v1619_v12 = vmul.f32 %v1618_v10, %v3244_v3  ;;  %v1624_v55 = vmul.f32 %v1623_v49, %v3244_v3  ;;  %v1638_v43 = vrot.slane %v3074_v61, %v2861_v34  ;;  %v1476_v21 = vrot.slane %v1474_v38, 4 }
 0x1ec   : > { %v1350_v41 = vadd.f32 %v1349_v45, %v1344_v58  ;;  %v1469_v31 = vadd.f32 %v1468_v24, %v1463_v18  ;;  %v1633_v7 = vmul.f32 %v1632_v30, %v3247_v6  ;;  %v1647_v33 = vrot.slane %v3074_v61, %v2864_v26 }
 0x1ed   : > { %v1626_v0 = vrot.slane %v1624_v55, 4  ;;  %v1639_v29 = vmul.f32 %v1638_v43, %v3247_v6  ;;  %v1653_v3 = vrot.slane %v3074_v61, %v2903_v39  ;;  %v1662_v15 = vrot.slane %v3074_v61, %v2909_v25 }
 0x1ee   : > { %2103 = vmatpush3.bf16.xpose.msk.msra.mxu1 %vm2889_vm11, %v2101_v1  ;;  %v1359_v57 = vadd.f32 %v1357_v17, %v1350_v41  ;;  %v1478_v34 = vadd.f32 %v1476_v21, %v1469_v31  ;;  %v1648_v36 = vmul.f32 %v3248_v28, %v1647_v33  ;;  %v1668_v47 = vrot.slane %v3074_v61, %v2915_v63 }
 0x1ef   : > { %2104 = vmatprep.subr.bf16.mxu1 %v2293_v16  ;;  %v1628_v46 = vadd.f32 %v1626_v0, %v1619_v12  ;;  %v1654_v26 = vmul.f32 %v3248_v28, %v1653_v3  ;;  %v1491_v52 = vrot.slane %v1489_v14, 4  ;;  %v1663_v6 = vmul.f32 %v3249_v20, %v1662_v15 }
 0x1f0   : > { %v1681_v16 = vrot.slane %v1359_v57, 4  ;;  %v1484_v45 = vadd.f32 %v1483_v11, %v1478_v34  ;;  %v1669_v2 = vmul.f32 %v3249_v20, %v1668_v47  ;;  %v1641_v40 = vrot.slane %v1639_v29, 4 }
 0x1f1   : > { %v1634_v39 = vadd.f32 %v1633_v7, %v1628_v46  ;;  %v1506_v56 = vrot.slane %v1504_v54, 4  ;;  %v1656_v61 = vrot.slane %v1654_v26, 4 }
 0x1f2   : > { %v1688_v5 = vsel %vm480_vm5, %v1194_v19, %v1681_v16  ;;  %v1493_v60 = vadd.f32 %v1491_v52, %v1484_v45  ;;  %v1671_v22 = vrot.slane %v1669_v2, 4 }
 0x1f3   : > { %v1643_v1 = vadd.f32 %v1641_v40, %v1634_v39 }
 0x1f4   : > { %v1499_v25 = vadd.f32 %v1498_v8, %v1493_v60 }
 0x1f5   : > { %v1649_v63 = vadd.f32 %v1648_v36, %v1643_v1 }
 0x1f6   : > { %v1508_v35 = vadd.f32 %v1506_v56, %v1499_v25 }
 0x1f7   : > { %v1658_v28 = vadd.f32 %v1656_v61, %v1649_v63 }
 0x1f9   : > { %v1664_v27 = vadd.f32 %v1663_v6, %v1658_v28 }
 0x1fb   : > { %v1673_v13 = vadd.f32 %v1671_v22, %v1664_v27 }
 0x1fd   : > { %v1684_v48 = vrot.slane %v1673_v13, 4 }
 0x1ff   : > { %v1689_v20 = vsel %vm480_vm5, %v1508_v35, %v1684_v48 }
 0x200   : > { %v2105_v44 = vpack.c.bf16 %v1689_v20, %v1688_v5 }
 0x202   : > { %2107 = vmatpush3.bf16.xpose.msk.msra.mxu1 %vm2889_vm11, %v2105_v44 }
 0x209   : > { %2082 = vmatmul.mubr.msk.f32.vlgmr.msra.gmra.mrb[0].mxu1 %vm488_vm9, %v1690_v50 }
 0x2dc   : > { %v1796_v42 = vpop.f32.mrb[0].mxu1 }
 0x2dd   : > { %1801 = vst.msk [vmem:[%s213_s8] sm:$0xff] %vm1800_vm12, %v1796_v42  ;;  %v2022_v23 = vpack.c.bf16 %v1796_v42, %v1796_v42  ;;  %v2083_v59 = vpop.f32.mrb[1].mxu1 }
 0x2df   : > { %1816 = vrot.lane.b32.xlu1 %v2022_v23, %s2296_s10  ;;  %1806 = vrot.lane.b32.xlu0 %v2022_v23, %s2297_s11 }
 0x2e0   : > { %2226 = shalt.err (!%p2223_p5)
}
 0x2e1   : > { %s2227_s5 = scalar_lea.hbm %s3152_s14, 128  ;;  %s2231_s8 = scalar_lea.hbm %s3208_s3, 256 }
 0x2e2   : > { %p2228_p6 = scmp.ne.s32.totalorder %s3152_s14, %s2227_s5  ;;  %p2232_p10 = scmp.lt.u32.totalorder %s3152_s14, %s3208_s3 }
 0x2e3   : > { %p2233_p11 = scmp.lt.u32.totalorder %s2231_s8, %s2227_s5  ;;  %p2235_p13 = scmp.lt.u32.totalorder %s2227_s5, %s3152_s14 }
 0x2e4   : > { %p2229_p7 = pnand %p2228_p6, %p2370_p4 }
 0x2e5   : > { %p2234_p12 = por %p2233_p11, %p2232_p10 }
 0x2e6   : > { %p2230_p9 = pneg %p2229_p7 }
 0x2e7   : > { %p2236_p0 = por %p2235_p13, %p2234_p12 }
 0x2e9   : > { %p2237_p1 = pnand %p2236_p0, %p2230_p9 }
 0x2eb   : > { %2240 = shalt.err (!%p2237_p1)
}
 0x2ec   : > { %2109 = dma.vmem_to_hbm [thread:$0]  (%p2370_p4), %s1870_s21, 128, %s3152_s14, %s1847_s22   ;;  %vm1809_vm13 = vcmask 27648  }
 0x2ed   : > { %s2299_s11 = smov 52   ;;  %s2300_s12 = smov 60  }
 0x2ee   : > { %1821 = vrot.lane.b32.xlu1 %v2022_v23, %s2299_s11  ;;  %1811 = vrot.lane.b32.xlu0 %v2022_v23, %s2300_s12  ;;  %s2301_s13 = smov 44   ;;  %s2302_s24 = smov 48  }
 0x2ef   : > { %s2303_s26 = smov 36   ;;  %s2304_s29 = smov 40  }
 0x2f0   : > { %s1983_s30 = sshll.u32 %s2283_s18, 3 }
 0x2f1   : > { %p232_p2 = scmp.lt.s32.totalorder %s1983_s30, 15 }
 0x2f2   : > { %1831 = vrot.lane.b32.xlu1 %v2022_v23, %s2301_s13  ;;  %1826 = vrot.lane.b32.xlu0 %v2022_v23, %s2302_s24 }
 0x2f3   : > { %s3258_s30 = smov (!%p232_p2, %s1983_s30), 15 }
 0x2f4   : > { %s1984_s5 = sshll.u32 %s3258_s30, 2 }
 0x2f5   : > { %s238_s14 = scalar_lea.vmem %s3209_s4, %s1984_s5 }
 0x2f6   : > { %1841 = vrot.lane.b32.xlu1 %v2022_v23, %s2303_s26  ;;  %1836 = vrot.lane.b32.xlu0 %v2022_v23, %s2304_s29 }
 0x351   : > { %v1817_v4 = vpop.permute.xlu1 %1816  ;;  %v1807_v53 = vpop.permute.xlu0 %1806 }
 0x352   : > { %2012 = vst.msk [vmem:[%s238_s14 + $0x8] sm:$0xf] %vm1809_vm13, %v1817_v4  ;;  %1810 = vst.msk [vmem:[%s238_s14] sm:$0xf] %vm1809_vm13, %v1807_v53 }
 0x360   : > { %v1822_v24 = vpop.permute.xlu1 %1821  ;;  %v1812_v38 = vpop.permute.xlu0 %1811 }
 0x361   : > { %2013 = vst.msk [vmem:[%s238_s14 + $0xc] sm:$0xf] %vm1809_vm13, %v1822_v24  ;;  %2011 = vst.msk [vmem:[%s238_s14 + $0x4] sm:$0xf] %vm1809_vm13, %v1812_v38 }
 0x364   : > { %v1832_v9 = vpop.permute.xlu1 %1831  ;;  %v1827_v19 = vpop.permute.xlu0 %1826 }
 0x365   : > { %2015 = vst.msk [vmem:[%s238_s14 + $0x14] sm:$0xf] %vm1809_vm13, %v1832_v9  ;;  %2014 = vst.msk [vmem:[%s238_s14 + $0x10] sm:$0xf] %vm1809_vm13, %v1827_v19 }
 0x368   : > { %v1842_v51 = vpop.permute.xlu1 %1841  ;;  %v1837_v11 = vpop.permute.xlu0 %1836 }
 0x369   : > { %2017 = vst.msk [vmem:[%s238_s14 + $0x1c] sm:$0xf] %vm1809_vm13, %v1842_v51  ;;  %2016 = vst.msk [vmem:[%s238_s14 + $0x18] sm:$0xf] %vm1809_vm13, %v1837_v11 }
 0x36a PF: > { %p2115_p4 = scmp.ge.s32.totalorder %s2291_s20, 2  ;;  %s1885_s18 = sand.u32 1, %s2271_s15  }
 0x36b   : > { %s1886_s21 = scalar_lea.sflag [#allocation3], %s1885_s18 }
 0x36c   : > { %p2112_p3 = pnand %p2115_p4, %p2377_p8 }
 0x36e   : > { %2266 = dma.done.wait (!%p2112_p3), %s1886_s21, 128  }
 0x36f   : > { %2268 = vsyncadd (!%p2112_p3), %s1886_s21, 4294967168  ;;  %s18_s20 = sadd.s32 1, %s2291_s20   ;;  %s3250_s15 = smov %s2275_s16 }
 0x370   : > { %p15_p5 = scmp.ge.s32.totalorder %s18_s20, 4   ;;  %s3251_s16 = smov %s2279_s17 }
 0x371   : > { %s3252_s17 = smov %s2383_s28  ;;  %s3253_s18 = smov %s2287_s19 }
 0x372   : > { %s3254_s19 = smov %s3256_s23  ;;  %17 = sbr.rel (!%p15_p5) target bundleno = 4 (0x4), region = 86 }
 0x379   :  { %1902 = vsyncpa [#allocation3], 1 }
 0x37a   :  { %1904 = vsyncpa [#allocation3 + $0x1], 1 }

</bundles_post_ra>
